<compile_context>
chip_gen: v7x
topology: tpu7x:2x2x1
jax: 0.10.0
libtpu: 0.0.40
codegen_flags: <defaults>
</compile_context>

<pallas_src>
import functools
import math

import jax
import jax.numpy as jnp
from jax.experimental import pallas as pl
from jax.experimental.pallas import tpu as pltpu

EPS = 1e-5                 # BatchNorm1d default eps
NEG_INF = -1000000000.0    # matches masked_fill(mask == 0, -1e9)

_DEFAULT_SCOPED_VMEM = 32 << 20   # v6e/v7x scoped default
_MAX_VMEM_LIMIT = 60 << 20        # stay under v7x's 64 MiB physical VMEM


# --------------------------------------------------------------------------
# tiling helpers
# --------------------------------------------------------------------------
def _pick_bblk(batch, seq, target_rows=512, score_budget=8 << 20):
    """Batch tile: >=2 grid steps when possible (v7x megacore), ~512 rows/step
    (v6e/v5e grid-overhead amortization), and (bblk,S,S) score tiles bounded."""
    cap = max(1, batch // 2) if batch >= 2 else batch
    bblk = max(1, min(cap, max(1, target_rows // max(seq, 1))))
    while bblk > 1 and bblk * seq * seq * 4 > score_budget:
        bblk -= 1
    while batch % bblk:
        bblk -= 1
    return max(bblk, 1)


def _pick_fblk(dff, d_model, budget=8 << 20):
    """D_ff tile: W1(D,fblk)+W2(fblk,D) bf16, double-buffered, within budget."""
    if dff % 128 != 0:
        return dff
    cap = max(128, budget // (8 * max(d_model, 1)))
    if dff <= cap:
        return dff
    for cand in (2048, 1024, 512, 256, 128):
        if cand <= cap and dff % cand == 0:
            return cand
    return dff


def _mosaic_params(dimension_semantics, est_vmem_bytes):
    kwargs = {}
    if est_vmem_bytes > _DEFAULT_SCOPED_VMEM:
        kwargs["vmem_limit_bytes"] = int(
            min(est_vmem_bytes * 1.25, _MAX_VMEM_LIMIT))
    return pltpu.CompilerParams(dimension_semantics=dimension_semantics, **kwargs)


# --------------------------------------------------------------------------
# Kernel 1: BatchNorm1d statistics -- lane-dense (native (B,S,D) layout).
#   Outputs per-(s,d) batch sums / sums-of-squares; the tiny regrouping into
#   viewed-BN channels ((s*D+d)//S) happens in the wrapper.
# --------------------------------------------------------------------------
def _bn_sums_kernel(x_ref, sum_ref, sq_ref):
    b = pl.program_id(0)
    x = x_ref[...]                               # (bblk, S, D) f32, lane = D
    s = jnp.sum(x, axis=0)                       # (S, D)
    q = jnp.sum(x * x, axis=0)                   # (S, D)

    @pl.when(b == 0)
    def _():
        sum_ref[...] = s
        sq_ref[...] = q

    @pl.when(b != 0)
    def _():
        sum_ref[...] += s
        sq_ref[...] += q


def bn_affine_maps(x, gamma, beta, bblk):
    """Per-(s, d) affine maps equivalent to the PyTorch view-trick BatchNorm1d."""
    B, S, D = x.shape
    out_sd = jax.ShapeDtypeStruct((S, D), jnp.float32)
    sums, sumsq = pl.pallas_call(
        _bn_sums_kernel,
        grid=(B // bblk,),
        out_shape=(out_sd, out_sd),
        in_specs=[pl.BlockSpec((bblk, S, D), lambda b: (b, 0, 0))],
        out_specs=(pl.BlockSpec((S, D), lambda b: (0, 0)),
                   pl.BlockSpec((S, D), lambda b: (0, 0))),
        compiler_params=_mosaic_params(("arbitrary",), bblk * S * D * 4 * 4),
    )(x)
    n = B * S
    # channel of element (s, d) in the viewed BN is (s*D + d) // S, i.e. channel
    # c covers S consecutive flat positions -> reshape((D, S)) (NOT a transpose).
    ch_sum = sums.reshape(D, S).sum(axis=-1)
    ch_sq = sumsq.reshape(D, S).sum(axis=-1)
    mean = ch_sum / n
    var = ch_sq / n - mean * mean
    scale = gamma * jax.lax.rsqrt(var + EPS)                 # (D,)
    shift = beta - mean * scale                              # (D,)
    a_map = jnp.repeat(scale, S).reshape(S, D)               # A[s, d]
    c_map = jnp.repeat(shift, S).reshape(S, D)               # C[s, d]
    return a_map, c_map


# --------------------------------------------------------------------------
# Kernel 2: fused BN + multi-head self-attention + W_o + residual
#   grid = (B // bblk,); heads are a static in-kernel loop over free static
#   column slices of the fused QKV matmul. One output write per block.
# --------------------------------------------------------------------------
def _mha_kernel(x_ref, a_ref, c_ref, amask_ref,
                wqkv_ref, bqkv_ref, wo_ref, bo_ref, o_ref,
                *, num_heads, scale):
    # fused BatchNorm (f32), computed ONCE per batch block
    xn = x_ref[...] * a_ref[...][None] + c_ref[...][None]        # (bblk, S, D)
    bblk, S, D = xn.shape
    M = bblk * S
    dk = D // num_heads
    x2 = xn.reshape(M, D).astype(jnp.bfloat16)                   # lane-dense rows

    # one fused, lane-dense QKV projection: (M, D) @ (D, 3D) on the MXU
    qkv = jnp.dot(x2, wqkv_ref[...],
                  preferred_element_type=jnp.float32) + bqkv_ref[...]
    qkv = qkv.astype(jnp.bfloat16)                               # (M, 3D)

    amask = amask_ref[...]                                       # (S, S) additive

    # static per-head loop (unrolled); all slices have static offsets.
    ctx_heads = []
    for h in range(num_heads):
        q = qkv[:, h * dk:(h + 1) * dk].reshape(bblk, S, dk)
        k = qkv[:, D + h * dk:D + (h + 1) * dk].reshape(bblk, S, dk)
        v = qkv[:, 2 * D + h * dk:2 * D + (h + 1) * dk].reshape(bblk, S, dk)

        s = jnp.einsum("bqd,bkd->bqk", q, k,
                       preferred_element_type=jnp.float32) * scale
        s = s + amask[None]
        s = s - jnp.max(s, axis=-1, keepdims=True)
        p = jnp.exp(s)
        p = p * pl.reciprocal(jnp.sum(p, axis=-1, keepdims=True), approx=True)

        ctx_heads.append(
            jnp.einsum("bqk,bkd->bqd", p.astype(jnp.bfloat16), v,
                       preferred_element_type=jnp.float32).reshape(M, dk))

    # combine_heads layout: head h occupies columns [h*dk, (h+1)*dk)
    ctx = jnp.concatenate(ctx_heads, axis=-1).astype(jnp.bfloat16)   # (M, D)

    # single full-width output projection (K = D) + residual; one store.
    out = jnp.dot(ctx, wo_ref[...], preferred_element_type=jnp.float32)
    o_ref[...] = xn + (out + bo_ref[...]).reshape(bblk, S, D)


def _mha_vmem_estimate(bblk, S, D):
    act = bblk * S * D
    return int(4 * act * 4                       # x + out blocks, double-buffered
               + 2 * (D * 3 * D + D * D) * 2     # bf16 weights, double-buffered
               + 2 * S * D * 4 * 2               # BN maps
               + 2 * S * S * 4                   # mask
               + act * 3 * (4 + 2)               # qkv f32 + bf16
               + 4 * bblk * S * S * 4            # scores / probs temporaries
               + act * (4 + 2))                  # ctx f32 + bf16


def mha_block(x, a_map, c_map, amask, p, num_heads, bblk):
    B, S, D = x.shape
    kernel = functools.partial(_mha_kernel, num_heads=num_heads,
                               scale=1.0 / math.sqrt(D // num_heads))
    return pl.pallas_call(
        kernel,
        grid=(B // bblk,),
        out_shape=jax.ShapeDtypeStruct((B, S, D), jnp.float32),
        in_specs=[
            pl.BlockSpec((bblk, S, D), lambda b: (b, 0, 0)),   # x
            pl.BlockSpec((S, D), lambda b: (0, 0)),            # BN scale map
            pl.BlockSpec((S, D), lambda b: (0, 0)),            # BN shift map
            pl.BlockSpec((S, S), lambda b: (0, 0)),            # additive mask
            pl.BlockSpec((D, 3 * D), lambda b: (0, 0)),        # W_qkv (bf16)
            pl.BlockSpec((1, 3 * D), lambda b: (0, 0)),        # b_qkv
            pl.BlockSpec((D, D), lambda b: (0, 0)),            # W_o (bf16)
            pl.BlockSpec((1, D), lambda b: (0, 0)),            # b_o
        ],
        out_specs=pl.BlockSpec((bblk, S, D), lambda b: (b, 0, 0)),
        compiler_params=_mosaic_params(("parallel",),
                                       _mha_vmem_estimate(bblk, S, D)),
    )(x, a_map, c_map, amask, p["wqkv"], p["bqkv"], p["wo"], p["bo"])


# --------------------------------------------------------------------------
# Kernel 3: fused BN + position-wise feed-forward + residual
#   grid = (B // bblk, DFF // fblk); D_ff tiles accumulate into the output.
#   BN + cast hoisted to f==0 (VMEM scratch); init merged with first accumulate.
# --------------------------------------------------------------------------
def _ffn_kernel(x_ref, a_ref, c_ref, w1_ref, b1_ref, w2_ref, b2_ref, o_ref,
                xn_scr, x2_scr):
    f = pl.program_id(1)

    @pl.when(f == 0)
    def _():
        xn = x_ref[...] * a_ref[...][None] + c_ref[...][None]   # fused BN, f32
        bblk, S, D = xn.shape
        xn_scr[...] = xn
        x2_scr[...] = xn.reshape(bblk * S, D).astype(jnp.bfloat16)

    x2 = x2_scr[...]                                            # (M, D) bf16
    hcol = jnp.dot(x2, w1_ref[...],
                   preferred_element_type=jnp.float32) + b1_ref[...]
    hcol = jnp.maximum(hcol, 0.0).astype(jnp.bfloat16)          # ReLU
    part = jnp.dot(hcol, w2_ref[...], preferred_element_type=jnp.float32)
    bblk, S, D = o_ref.shape
    part3 = part.reshape(bblk, S, D)

    @pl.when(f == 0)
    def _():
        # residual (dropout = identity) + fc2 bias + first partial, one store
        o_ref[...] = xn_scr[...] + b2_ref[...][None] + part3

    @pl.when(f != 0)
    def _():
        o_ref[...] += part3


def _ffn_vmem_estimate(bblk, S, D, fblk):
    act = bblk * S * D
    return int(4 * act * 4                       # x + out blocks, double-buffered
               + 2 * 2 * D * fblk * 2            # W1 + W2 bf16 tiles, db
               + 2 * S * D * 4 * 2               # BN maps
               + act * (4 + 2)                   # xn f32 + x2 bf16 scratch
               + 2 * bblk * S * fblk * 4)        # hidden column temporaries


def ffn_block(x, a_map, c_map, p, bblk):
    B, S, D = x.shape
    DFF = p["w1"].shape[1]
    fblk = _pick_fblk(DFF, D)
    return pl.pallas_call(
        _ffn_kernel,
        grid=(B // bblk, DFF // fblk),
        out_shape=jax.ShapeDtypeStruct((B, S, D), jnp.float32),
        in_specs=[
            pl.BlockSpec((bblk, S, D), lambda b, f: (b, 0, 0)),   # x
            pl.BlockSpec((S, D), lambda b, f: (0, 0)),            # BN scale map
            pl.BlockSpec((S, D), lambda b, f: (0, 0)),            # BN shift map
            pl.BlockSpec((D, fblk), lambda b, f: (0, f)),         # W1 tile (bf16)
            pl.BlockSpec((1, fblk), lambda b, f: (0, f)),         # b1 tile
            pl.BlockSpec((fblk, D), lambda b, f: (f, 0)),         # W2 tile (bf16)
            pl.BlockSpec((1, D), lambda b, f: (0, 0)),            # b2
        ],
        out_specs=pl.BlockSpec((bblk, S, D), lambda b, f: (b, 0, 0)),
        scratch_shapes=[pltpu.VMEM((bblk, S, D), jnp.float32),
                        pltpu.VMEM((bblk * S, D), jnp.bfloat16)],
        compiler_params=_mosaic_params(("parallel", "arbitrary"),
                                       _ffn_vmem_estimate(bblk, S, D, fblk)),
    )(x, a_map, c_map, p["w1"], p["b1"], p["w2"], p["b2"])


# --------------------------------------------------------------------------
# EncoderLayer forward
# --------------------------------------------------------------------------
def encoder_layer(x, mask, params, num_heads):
    B, S, D = x.shape
    bblk = _pick_bblk(B, S)
    # additive mask precomputed once (no per-tile compare+select on the VPU)
    amask = jnp.where(mask == 0, jnp.float32(NEG_INF), jnp.float32(0.0))  # (S,S)

    # norm1 (fused into attention): lane-dense stats pass + per-(s,d) affine maps
    a1, c1 = bn_affine_maps(x, params["bn1_gamma"], params["bn1_beta"], bblk)
    x = mha_block(x, a1, c1, amask, params, num_heads, bblk)

    # norm2 (fused into FFN)
    a2, c2 = bn_affine_maps(x, params["bn2_gamma"], params["bn2_beta"], bblk)
    x = ffn_block(x, a2, c2, params, bblk)
    return x


# --------------------------------------------------------------------------
# Parameters: raw init (weights stored (in, out): kernels do x @ W) and the
# one-time packing (fused QKV concat + bf16 casts) done OUTSIDE the jitted fwd.
# --------------------------------------------------------------------------
def init_params(key, d_model, d_ff):
    ks = jax.random.split(key, 16)
    s = 0.1
    n = lambda k, shp: jax.random.normal(k, shp, jnp.float32) * s
    return {
        "bn1_gamma": 1.0 + n(ks[0], (d_model,)),
        "bn1_beta": n(ks[1], (d_model,)),
        "bn2_gamma": 1.0 + n(ks[2], (d_model,)),
        "bn2_beta": n(ks[3], (d_model,)),
        "wq": n(ks[4], (d_model, d_model)), "bq": n(ks[5], (1, d_model)),
        "wk": n(ks[6], (d_model, d_model)), "bk": n(ks[7], (1, d_model)),
        "wv": n(ks[8], (d_model, d_model)), "bv": n(ks[9], (1, d_model)),
        "wo": n(ks[10], (d_model, d_model)), "bo": n(ks[11], (1, d_model)),
        "w1": n(ks[12], (d_model, d_ff)), "b1": n(ks[13], (1, d_ff)),
        "w2": n(ks[14], (d_ff, d_model)), "b2": n(ks[15], (1, d_model)),
    }


def prepare_params(p):
    """Pre-pack weights once (fused QKV concat + bf16 cast); call outside jit."""
    bf16 = jnp.bfloat16
    return {
        "bn1_gamma": p["bn1_gamma"], "bn1_beta": p["bn1_beta"],
        "bn2_gamma": p["bn2_gamma"], "bn2_beta": p["bn2_beta"],
        "wqkv": jnp.concatenate([p["wq"], p["wk"], p["wv"]], axis=1).astype(bf16),
        "bqkv": jnp.concatenate([p["bq"], p["bk"], p["bv"]], axis=1),
        "wo": p["wo"].astype(bf16), "bo": p["bo"],
        "w1": p["w1"].astype(bf16), "b1": p["b1"],
        "w2": p["w2"].astype(bf16), "b2": p["b2"],
    }


# --------------------------------------------------------------------------
# Pure-JAX reference (mirrors the PyTorch math).
#   bf16_matmul=True  -> same matmul numerics as the kernel (tight check)
#   bf16_matmul=False -> true f32 math (loose check, bf16 rounding budget)
# --------------------------------------------------------------------------
def reference(x, mask, p, num_heads, *, bf16_matmul):
    B, S, D = x.shape
    dk = D // num_heads
    if bf16_matmul:
        cast = lambda t: t.astype(jnp.bfloat16)
        prec = None
    else:
        cast = lambda t: t
        prec = jax.lax.Precision.HIGHEST

    def mm(a, b):
        return jnp.dot(cast(a), cast(b), precision=prec,
                       preferred_element_type=jnp.float32)

    def bn(t, g, bta):
        tv = t.reshape(B, D, S)
        m = tv.mean(axis=(0, 2), keepdims=True)
        v = ((tv - m) ** 2).mean(axis=(0, 2), keepdims=True)
        y = (tv - m) / jnp.sqrt(v + EPS) * g[None, :, None] + bta[None, :, None]
        return y.reshape(B, S, D)

    xn = bn(x, p["bn1_gamma"], p["bn1_beta"])
    x2 = xn.reshape(B * S, D)
    q = (mm(x2, p["wq"]) + p["bq"]).reshape(B, S, num_heads, dk).transpose(0, 2, 1, 3)
    k = (mm(x2, p["wk"]) + p["bk"]).reshape(B, S, num_heads, dk).transpose(0, 2, 1, 3)
    v = (mm(x2, p["wv"]) + p["bv"]).reshape(B, S, num_heads, dk).transpose(0, 2, 1, 3)
    scores = jnp.einsum("bhqd,bhkd->bhqk", cast(q), cast(k), precision=prec,
                        preferred_element_type=jnp.float32) / math.sqrt(dk)
    scores = jnp.where(mask[None, None] == 0, NEG_INF, scores)
    probs = jax.nn.softmax(scores, axis=-1)
    ctx = jnp.einsum("bhqk,bhkd->bhqd", cast(probs), cast(v), precision=prec,
                     preferred_element_type=jnp.float32)
    ctx = ctx.transpose(0, 2, 1, 3).reshape(B * S, D)
    y = xn + (mm(ctx, p["wo"]) + p["bo"]).reshape(B, S, D)

    yn = bn(y, p["bn2_gamma"], p["bn2_beta"])
    h = jnp.maximum(mm(yn.reshape(B * S, D), p["w1"]) + p["b1"], 0.0)
    ff = (mm(h, p["w2"]) + p["b2"]).reshape(B, S, D)
    return yn + ff


if __name__ == "__main__":
    # small, lane-dense shapes: D and DFF are multiples of 128
    B, S, D, H, DFF = 2, 16, 128, 4, 256
    key = jax.random.PRNGKey(0)
    kx, kp = jax.random.split(key)
    x = jax.random.normal(kx, (B, S, D), jnp.float32)
    mask = jnp.tril(jnp.ones((S, S), jnp.float32))   # causal 0/1 mask (broadcast)
    raw_params = init_params(kp, D, DFF)
    params = prepare_params(raw_params)              # packed once, outside jit

    fwd = jax.jit(functools.partial(encoder_layer, num_heads=H))
    out = jax.block_until_ready(fwd(x, mask, params))
    assert out.shape == (B, S, D)

    # primary gate: matched-precision reference (same bf16-operand matmuls)
    ref_match = reference(x, mask, raw_params, H, bf16_matmul=True)
    err_match = float(jnp.max(jnp.abs(out - ref_match)))
    assert jnp.allclose(out, ref_match, atol=3e-2, rtol=3e-2), \
        f"matched-precision max abs err {err_match}"

    # sanity gate: true-f32 reference, within the bf16-matmul rounding budget
    ref_f32 = reference(x, mask, raw_params, H, bf16_matmul=False)
    err_f32 = float(jnp.max(jnp.abs(out - ref_f32)))
    assert jnp.allclose(out, ref_f32, atol=1.5e-1, rtol=5e-2), \
        f"f32-reference max abs err {err_f32}"

    print("KERNEL_OK")
</pallas_src>

<mosaic_0001>
module attributes {stable_mosaic.version = 11 : i64} {
  func.func @_bn_sums_kernel(%arg0: i32, %arg1: memref<1x16x128xf32, #tpu.memory_space<vmem>>, %arg2: memref<16x128xf32, #tpu.memory_space<vmem>>, %arg3: memref<16x128xf32, #tpu.memory_space<vmem>>) attributes {dimension_semantics = [#tpu.dimension_semantics<arbitrary>], iteration_bounds = array<i64: 2>, scalar_prefetch = 0 : i64, scratch_operands = 0 : i64, tpu.core_type = #tpu.core_type<tc>, window_params = [{transform_indices = @transform_0, window_bounds = array<i64: 1, 16, 128>}, {pipeline_mode = #tpu.pipeline_mode<synchronous>, transform_indices = @transform_1, window_bounds = array<i64: 16, 128>}, {pipeline_mode = #tpu.pipeline_mode<synchronous>, transform_indices = @transform_2, window_bounds = array<i64: 16, 128>}]} {
    %c0 = arith.constant 0 : index
    %c0_0 = arith.constant 0 : index
    %c0_1 = arith.constant 0 : index
    %0 = vector.load %arg1[%c0, %c0_0, %c0_1] : memref<1x16x128xf32, #tpu.memory_space<vmem>>, vector<1x16x128xf32>
    %cst = arith.constant dense<0.000000e+00> : vector<16x128xf32>
    %1 = vector.multi_reduction <add>, %0, %cst [0] : vector<1x16x128xf32> to vector<16x128xf32>
    %2 = arith.mulf %0, %0 : vector<1x16x128xf32>
    %cst_2 = arith.constant dense<0.000000e+00> : vector<16x128xf32>
    %3 = vector.multi_reduction <add>, %2, %cst_2 [0] : vector<1x16x128xf32> to vector<16x128xf32>
    %c0_i32 = arith.constant 0 : i32
    %4 = arith.cmpi eq, %arg0, %c0_i32 : i32
    %5 = arith.extui %4 : i1 to i32
    %c0_i32_3 = arith.constant 0 : i32
    %6 = arith.cmpi ne, %5, %c0_i32_3 : i32
    scf.if %6 {
      %c0_6 = arith.constant 0 : index
      %c0_7 = arith.constant 0 : index
      %10 = vector.load %arg2[%c0_6, %c0_7] : memref<16x128xf32, #tpu.memory_space<vmem>>, vector<16x128xf32>
      tpu.vector_store %arg2[%c0_6, %c0_7], %1 {strides = array<i32>} : memref<16x128xf32, #tpu.memory_space<vmem>>, vector<16x128xf32>,
      %c0_8 = arith.constant 0 : index
      %c0_9 = arith.constant 0 : index
      %11 = vector.load %arg3[%c0_8, %c0_9] : memref<16x128xf32, #tpu.memory_space<vmem>>, vector<16x128xf32>
      tpu.vector_store %arg3[%c0_8, %c0_9], %3 {strides = array<i32>} : memref<16x128xf32, #tpu.memory_space<vmem>>, vector<16x128xf32>,
    } else {
    }
    %c0_i32_4 = arith.constant 0 : i32
    %7 = arith.cmpi ne, %arg0, %c0_i32_4 : i32
    %8 = arith.extui %7 : i1 to i32
    %c0_i32_5 = arith.constant 0 : i32
    %9 = arith.cmpi ne, %8, %c0_i32_5 : i32
    scf.if %9 {
      %c0_6 = arith.constant 0 : index
      %c0_7 = arith.constant 0 : index
      %10 = vector.load %arg2[%c0_6, %c0_7] : memref<16x128xf32, #tpu.memory_space<vmem>>, vector<16x128xf32>
      %11 = arith.addf %10, %1 : vector<16x128xf32>
      %c0_8 = arith.constant 0 : index
      %c0_9 = arith.constant 0 : index
      %12 = vector.load %arg2[%c0_8, %c0_9] : memref<16x128xf32, #tpu.memory_space<vmem>>, vector<16x128xf32>
      tpu.vector_store %arg2[%c0_8, %c0_9], %11 {strides = array<i32>} : memref<16x128xf32, #tpu.memory_space<vmem>>, vector<16x128xf32>,
      %c0_10 = arith.constant 0 : index
      %c0_11 = arith.constant 0 : index
      %13 = vector.load %arg3[%c0_10, %c0_11] : memref<16x128xf32, #tpu.memory_space<vmem>>, vector<16x128xf32>
      %14 = arith.addf %13, %3 : vector<16x128xf32>
      %c0_12 = arith.constant 0 : index
      %c0_13 = arith.constant 0 : index
      %15 = vector.load %arg3[%c0_12, %c0_13] : memref<16x128xf32, #tpu.memory_space<vmem>>, vector<16x128xf32>
      tpu.vector_store %arg3[%c0_12, %c0_13], %14 {strides = array<i32>} : memref<16x128xf32, #tpu.memory_space<vmem>>, vector<16x128xf32>,
    } else {
    }
    return
  }
  func.func @transform_0(%arg0: i32) -> (i32, i32, i32) {
    %c0_i32 = arith.constant 0 : i32
    %c0_i32_0 = arith.constant 0 : i32
    %c0_i32_1 = arith.constant 0 : i32
    return %arg0, %c0_i32, %c0_i32_0 : i32, i32, i32
  }
  func.func @transform_1(%arg0: i32) -> (i32, i32) {
    %c0_i32 = arith.constant 0 : i32
    %c0_i32_0 = arith.constant 0 : i32
    %c0_i32_1 = arith.constant 0 : i32
    return %c0_i32, %c0_i32_0 : i32, i32
  }
  func.func @transform_2(%arg0: i32) -> (i32, i32) {
    %c0_i32 = arith.constant 0 : i32
    %c0_i32_0 = arith.constant 0 : i32
    %c0_i32_1 = arith.constant 0 : i32
    return %c0_i32, %c0_i32_0 : i32, i32
  }
}

module attributes {stable_mosaic.version = 11 : i64} {
  func.func @_mha_kernel(%arg0: i32, %arg1: memref<1x16x128xf32, #tpu.memory_space<vmem>>, %arg2: memref<16x128xf32, #tpu.memory_space<vmem>>, %arg3: memref<16x128xf32, #tpu.memory_space<vmem>>, %arg4: memref<16x16xf32, #tpu.memory_space<vmem>>, %arg5: memref<128x384xbf16, #tpu.memory_space<vmem>>, %arg6: memref<1x384xf32, #tpu.memory_space<vmem>>, %arg7: memref<128x128xbf16, #tpu.memory_space<vmem>>, %arg8: memref<1x128xf32, #tpu.memory_space<vmem>>, %arg9: memref<1x16x128xf32, #tpu.memory_space<vmem>>) attributes {dimension_semantics = [#tpu.dimension_semantics<parallel>], iteration_bounds = array<i64: 2>, scalar_prefetch = 0 : i64, scratch_operands = 0 : i64, tpu.core_type = #tpu.core_type<tc>, window_params = [{transform_indices = @transform_0, window_bounds = array<i64: 1, 16, 128>}, {pipeline_mode = #tpu.pipeline_mode<synchronous>, transform_indices = @transform_1, window_bounds = array<i64: 16, 128>}, {pipeline_mode = #tpu.pipeline_mode<synchronous>, transform_indices = @transform_2, window_bounds = array<i64: 16, 128>}, {pipeline_mode = #tpu.pipeline_mode<synchronous>, transform_indices = @transform_3, window_bounds = array<i64: 16, 16>}, {pipeline_mode = #tpu.pipeline_mode<synchronous>, transform_indices = @transform_4, window_bounds = array<i64: 128, 384>}, {pipeline_mode = #tpu.pipeline_mode<synchronous>, transform_indices = @transform_5, window_bounds = array<i64: 1, 384>}, {pipeline_mode = #tpu.pipeline_mode<synchronous>, transform_indices = @transform_6, window_bounds = array<i64: 128, 128>}, {pipeline_mode = #tpu.pipeline_mode<synchronous>, transform_indices = @transform_7, window_bounds = array<i64: 1, 128>}, {transform_indices = @transform_8, window_bounds = array<i64: 1, 16, 128>}]} {
    %c0 = arith.constant 0 : index
    %c0_0 = arith.constant 0 : index
    %c0_1 = arith.constant 0 : index
    %0 = vector.load %arg1[%c0, %c0_0, %c0_1] : memref<1x16x128xf32, #tpu.memory_space<vmem>>, vector<1x16x128xf32>
    %c0_2 = arith.constant 0 : index
    %c0_3 = arith.constant 0 : index
    %1 = vector.load %arg2[%c0_2, %c0_3] : memref<16x128xf32, #tpu.memory_space<vmem>>, vector<16x128xf32>
    %2 = vector.shape_cast %1 : vector<16x128xf32> to vector<1x16x128xf32>
    %3 = arith.mulf %0, %2 : vector<1x16x128xf32>
    %c0_4 = arith.constant 0 : index
    %c0_5 = arith.constant 0 : index
    %4 = vector.load %arg3[%c0_4, %c0_5] : memref<16x128xf32, #tpu.memory_space<vmem>>, vector<16x128xf32>
    %5 = vector.shape_cast %4 : vector<16x128xf32> to vector<1x16x128xf32>
    %6 = arith.addf %3, %5 : vector<1x16x128xf32>
    %7 = vector.shape_cast %6 : vector<1x16x128xf32> to vector<16x128xf32>
    %8 = arith.truncf %7 : vector<16x128xf32> to vector<16x128xbf16>
    %c0_6 = arith.constant 0 : index
    %c0_7 = arith.constant 0 : index
    %9 = vector.load %arg5[%c0_6, %c0_7] : memref<128x384xbf16, #tpu.memory_space<vmem>>, vector<128x384xbf16>
    %cst = arith.constant dense<0.000000e+00> : vector<16x384xf32>
    %10 = tpu.matmul %8, %9, %cst {dimension_numbers = #tpu.dot_dimension_numbers<[1], [0], [0], [1], [0, 0, 1, 1], [], []>} : vector<16x128xbf16>, vector<128x384xbf16>, vector<16x384xf32> -> vector<16x384xf32>
    %c0_8 = arith.constant 0 : index
    %c0_9 = arith.constant 0 : index
    %11 = vector.load %arg6[%c0_8, %c0_9] : memref<1x384xf32, #tpu.memory_space<vmem>>, vector<1x384xf32>
    %12 = vector.broadcast %11 : vector<1x384xf32> to vector<16x384xf32>
    %13 = arith.addf %10, %12 : vector<16x384xf32>
    %14 = arith.truncf %13 : vector<16x384xf32> to vector<16x384xbf16>
    %c0_10 = arith.constant 0 : index
    %c0_11 = arith.constant 0 : index
    %15 = vector.load %arg4[%c0_10, %c0_11] : memref<16x16xf32, #tpu.memory_space<vmem>>, vector<16x16xf32>
    %16 = vector.extract_strided_slice %14 {offsets = [0, 0], sizes = [16, 32], strides = [1, 1]} : vector<16x384xbf16> to vector<16x32xbf16>
    %17 = vector.shape_cast %16 : vector<16x32xbf16> to vector<1x16x32xbf16>
    %18 = vector.extract_strided_slice %14 {offsets = [0, 128], sizes = [16, 32], strides = [1, 1]} : vector<16x384xbf16> to vector<16x32xbf16>
    %19 = vector.shape_cast %18 : vector<16x32xbf16> to vector<1x16x32xbf16>
    %20 = vector.extract_strided_slice %14 {offsets = [0, 256], sizes = [16, 32], strides = [1, 1]} : vector<16x384xbf16> to vector<16x32xbf16>
    %21 = vector.shape_cast %20 : vector<16x32xbf16> to vector<1x16x32xbf16>
    "tpu.trace_start"() <{level = 10 : i32, message = "bqd,bkd->bqk"}> : () -> ()
    %cst_12 = arith.constant dense<0.000000e+00> : vector<1x16x16xf32>
    %22 = tpu.matmul %17, %19, %cst_12 {dimension_numbers = #tpu.dot_dimension_numbers<[2], [2], [1], [1], [0, 0, 0, 1, 1, 1], [0], [0]>} : vector<1x16x32xbf16>, vector<1x16x32xbf16>, vector<1x16x16xf32> -> vector<1x16x16xf32>
    "tpu.trace_stop"() : () -> ()
    %cst_13 = arith.constant 0.176776692 : f32
    %23 = vector.broadcast %cst_13 : f32 to vector<1x16x16xf32>
    %24 = arith.mulf %22, %23 : vector<1x16x16xf32>
    %25 = vector.shape_cast %15 : vector<16x16xf32> to vector<1x16x16xf32>
    %26 = arith.addf %24, %25 : vector<1x16x16xf32>
    %cst_14 = arith.constant dense<0xFF800000> : vector<1x16xf32>
    %27 = vector.multi_reduction <maximumf>, %26, %cst_14 [2] : vector<1x16x16xf32> to vector<1x16xf32>
    %28 = vector.shape_cast %27 : vector<1x16xf32> to vector<1x16x1xf32>
    %29 = vector.broadcast %28 : vector<1x16x1xf32> to vector<1x16x16xf32>
    %30 = arith.subf %26, %29 : vector<1x16x16xf32>
    %31 = math.exp %30 : vector<1x16x16xf32>
    %cst_15 = arith.constant dense<0.000000e+00> : vector<1x16xf32>
    %32 = vector.multi_reduction <add>, %31, %cst_15 [2] : vector<1x16x16xf32> to vector<1x16xf32>
    %33 = vector.shape_cast %32 : vector<1x16xf32> to vector<1x16x1xf32>
    %34 = tpu.reciprocal %33 {approx = true} : vector<1x16x1xf32> -> vector<1x16x1xf32>
    %35 = vector.broadcast %34 : vector<1x16x1xf32> to vector<1x16x16xf32>
    %36 = arith.mulf %31, %35 : vector<1x16x16xf32>
    %37 = arith.truncf %36 : vector<1x16x16xf32> to vector<1x16x16xbf16>
    "tpu.trace_start"() <{level = 10 : i32, message = "bqk,bkd->bqd"}> : () -> ()
    %cst_16 = arith.constant dense<0.000000e+00> : vector<1x16x32xf32>
    %38 = tpu.matmul %37, %21, %cst_16 {dimension_numbers = #tpu.dot_dimension_numbers<[2], [1], [1], [2], [0, 0, 0, 1, 1, 2], [0], [0]>} : vector<1x16x16xbf16>, vector<1x16x32xbf16>, vector<1x16x32xf32> -> vector<1x16x32xf32>
    "tpu.trace_stop"() : () -> ()
    %39 = vector.shape_cast %38 : vector<1x16x32xf32> to vector<16x32xf32>
    %40 = vector.extract_strided_slice %14 {offsets = [0, 32], sizes = [16, 32], strides = [1, 1]} : vector<16x384xbf16> to vector<16x32xbf16>
    %41 = vector.shape_cast %40 : vector<16x32xbf16> to vector<1x16x32xbf16>
    %42 = vector.extract_strided_slice %14 {offsets = [0, 160], sizes = [16, 32], strides = [1, 1]} : vector<16x384xbf16> to vector<16x32xbf16>
    %43 = vector.shape_cast %42 : vector<16x32xbf16> to vector<1x16x32xbf16>
    %44 = vector.extract_strided_slice %14 {offsets = [0, 288], sizes = [16, 32], strides = [1, 1]} : vector<16x384xbf16> to vector<16x32xbf16>
    %45 = vector.shape_cast %44 : vector<16x32xbf16> to vector<1x16x32xbf16>
    "tpu.trace_start"() <{level = 10 : i32, message = "bqd,bkd->bqk"}> : () -> ()
    %cst_17 = arith.constant dense<0.000000e+00> : vector<1x16x16xf32>
    %46 = tpu.matmul %41, %43, %cst_17 {dimension_numbers = #tpu.dot_dimension_numbers<[2], [2], [1], [1], [0, 0, 0, 1, 1, 1], [0], [0]>} : vector<1x16x32xbf16>, vector<1x16x32xbf16>, vector<1x16x16xf32> -> vector<1x16x16xf32>
    "tpu.trace_stop"() : () -> ()
    %cst_18 = arith.constant 0.176776692 : f32
    %47 = vector.broadcast %cst_18 : f32 to vector<1x16x16xf32>
    %48 = arith.mulf %46, %47 : vector<1x16x16xf32>
    %49 = vector.shape_cast %15 : vector<16x16xf32> to vector<1x16x16xf32>
    %50 = arith.addf %48, %49 : vector<1x16x16xf32>
    %cst_19 = arith.constant dense<0xFF800000> : vector<1x16xf32>
    %51 = vector.multi_reduction <maximumf>, %50, %cst_19 [2] : vector<1x16x16xf32> to vector<1x16xf32>
    %52 = vector.shape_cast %51 : vector<1x16xf32> to vector<1x16x1xf32>
    %53 = vector.broadcast %52 : vector<1x16x1xf32> to vector<1x16x16xf32>
    %54 = arith.subf %50, %53 : vector<1x16x16xf32>
    %55 = math.exp %54 : vector<1x16x16xf32>
    %cst_20 = arith.constant dense<0.000000e+00> : vector<1x16xf32>
    %56 = vector.multi_reduction <add>, %55, %cst_20 [2] : vector<1x16x16xf32> to vector<1x16xf32>
    %57 = vector.shape_cast %56 : vector<1x16xf32> to vector<1x16x1xf32>
    %58 = tpu.reciprocal %57 {approx = true} : vector<1x16x1xf32> -> vector<1x16x1xf32>
    %59 = vector.broadcast %58 : vector<1x16x1xf32> to vector<1x16x16xf32>
    %60 = arith.mulf %55, %59 : vector<1x16x16xf32>
    %61 = arith.truncf %60 : vector<1x16x16xf32> to vector<1x16x16xbf16>
    "tpu.trace_start"() <{level = 10 : i32, message = "bqk,bkd->bqd"}> : () -> ()
    %cst_21 = arith.constant dense<0.000000e+00> : vector<1x16x32xf32>
    %62 = tpu.matmul %61, %45, %cst_21 {dimension_numbers = #tpu.dot_dimension_numbers<[2], [1], [1], [2], [0, 0, 0, 1, 1, 2], [0], [0]>} : vector<1x16x16xbf16>, vector<1x16x32xbf16>, vector<1x16x32xf32> -> vector<1x16x32xf32>
    "tpu.trace_stop"() : () -> ()
    %63 = vector.shape_cast %62 : vector<1x16x32xf32> to vector<16x32xf32>
    %64 = vector.extract_strided_slice %14 {offsets = [0, 64], sizes = [16, 32], strides = [1, 1]} : vector<16x384xbf16> to vector<16x32xbf16>
    %65 = vector.shape_cast %64 : vector<16x32xbf16> to vector<1x16x32xbf16>
    %66 = vector.extract_strided_slice %14 {offsets = [0, 192], sizes = [16, 32], strides = [1, 1]} : vector<16x384xbf16> to vector<16x32xbf16>
    %67 = vector.shape_cast %66 : vector<16x32xbf16> to vector<1x16x32xbf16>
    %68 = vector.extract_strided_slice %14 {offsets = [0, 320], sizes = [16, 32], strides = [1, 1]} : vector<16x384xbf16> to vector<16x32xbf16>
    %69 = vector.shape_cast %68 : vector<16x32xbf16> to vector<1x16x32xbf16>
    "tpu.trace_start"() <{level = 10 : i32, message = "bqd,bkd->bqk"}> : () -> ()
    %cst_22 = arith.constant dense<0.000000e+00> : vector<1x16x16xf32>
    %70 = tpu.matmul %65, %67, %cst_22 {dimension_numbers = #tpu.dot_dimension_numbers<[2], [2], [1], [1], [0, 0, 0, 1, 1, 1], [0], [0]>} : vector<1x16x32xbf16>, vector<1x16x32xbf16>, vector<1x16x16xf32> -> vector<1x16x16xf32>
    "tpu.trace_stop"() : () -> ()
    %cst_23 = arith.constant 0.176776692 : f32
    %71 = vector.broadcast %cst_23 : f32 to vector<1x16x16xf32>
    %72 = arith.mulf %70, %71 : vector<1x16x16xf32>
    %73 = vector.shape_cast %15 : vector<16x16xf32> to vector<1x16x16xf32>
    %74 = arith.addf %72, %73 : vector<1x16x16xf32>
    %cst_24 = arith.constant dense<0xFF800000> : vector<1x16xf32>
    %75 = vector.multi_reduction <maximumf>, %74, %cst_24 [2] : vector<1x16x16xf32> to vector<1x16xf32>
    %76 = vector.shape_cast %75 : vector<1x16xf32> to vector<1x16x1xf32>
    %77 = vector.broadcast %76 : vector<1x16x1xf32> to vector<1x16x16xf32>
    %78 = arith.subf %74, %77 : vector<1x16x16xf32>
    %79 = math.exp %78 : vector<1x16x16xf32>
    %cst_25 = arith.constant dense<0.000000e+00> : vector<1x16xf32>
    %80 = vector.multi_reduction <add>, %79, %cst_25 [2] : vector<1x16x16xf32> to vector<1x16xf32>
    %81 = vector.shape_cast %80 : vector<1x16xf32> to vector<1x16x1xf32>
    %82 = tpu.reciprocal %81 {approx = true} : vector<1x16x1xf32> -> vector<1x16x1xf32>
    %83 = vector.broadcast %82 : vector<1x16x1xf32> to vector<1x16x16xf32>
    %84 = arith.mulf %79, %83 : vector<1x16x16xf32>
    %85 = arith.truncf %84 : vector<1x16x16xf32> to vector<1x16x16xbf16>
    "tpu.trace_start"() <{level = 10 : i32, message = "bqk,bkd->bqd"}> : () -> ()
    %cst_26 = arith.constant dense<0.000000e+00> : vector<1x16x32xf32>
    %86 = tpu.matmul %85, %69, %cst_26 {dimension_numbers = #tpu.dot_dimension_numbers<[2], [1], [1], [2], [0, 0, 0, 1, 1, 2], [0], [0]>} : vector<1x16x16xbf16>, vector<1x16x32xbf16>, vector<1x16x32xf32> -> vector<1x16x32xf32>
    "tpu.trace_stop"() : () -> ()
    %87 = vector.shape_cast %86 : vector<1x16x32xf32> to vector<16x32xf32>
    %88 = vector.extract_strided_slice %14 {offsets = [0, 96], sizes = [16, 32], strides = [1, 1]} : vector<16x384xbf16> to vector<16x32xbf16>
    %89 = vector.shape_cast %88 : vector<16x32xbf16> to vector<1x16x32xbf16>
    %90 = vector.extract_strided_slice %14 {offsets = [0, 224], sizes = [16, 32], strides = [1, 1]} : vector<16x384xbf16> to vector<16x32xbf16>
    %91 = vector.shape_cast %90 : vector<16x32xbf16> to vector<1x16x32xbf16>
    %92 = vector.extract_strided_slice %14 {offsets = [0, 352], sizes = [16, 32], strides = [1, 1]} : vector<16x384xbf16> to vector<16x32xbf16>
    %93 = vector.shape_cast %92 : vector<16x32xbf16> to vector<1x16x32xbf16>
    "tpu.trace_start"() <{level = 10 : i32, message = "bqd,bkd->bqk"}> : () -> ()
    %cst_27 = arith.constant dense<0.000000e+00> : vector<1x16x16xf32>
    %94 = tpu.matmul %89, %91, %cst_27 {dimension_numbers = #tpu.dot_dimension_numbers<[2], [2], [1], [1], [0, 0, 0, 1, 1, 1], [0], [0]>} : vector<1x16x32xbf16>, vector<1x16x32xbf16>, vector<1x16x16xf32> -> vector<1x16x16xf32>
    "tpu.trace_stop"() : () -> ()
    %cst_28 = arith.constant 0.176776692 : f32
    %95 = vector.broadcast %cst_28 : f32 to vector<1x16x16xf32>
    %96 = arith.mulf %94, %95 : vector<1x16x16xf32>
    %97 = vector.shape_cast %15 : vector<16x16xf32> to vector<1x16x16xf32>
    %98 = arith.addf %96, %97 : vector<1x16x16xf32>
    %cst_29 = arith.constant dense<0xFF800000> : vector<1x16xf32>
    %99 = vector.multi_reduction <maximumf>, %98, %cst_29 [2] : vector<1x16x16xf32> to vector<1x16xf32>
    %100 = vector.shape_cast %99 : vector<1x16xf32> to vector<1x16x1xf32>
    %101 = vector.broadcast %100 : vector<1x16x1xf32> to vector<1x16x16xf32>
    %102 = arith.subf %98, %101 : vector<1x16x16xf32>
    %103 = math.exp %102 : vector<1x16x16xf32>
    %cst_30 = arith.constant dense<0.000000e+00> : vector<1x16xf32>
    %104 = vector.multi_reduction <add>, %103, %cst_30 [2] : vector<1x16x16xf32> to vector<1x16xf32>
    %105 = vector.shape_cast %104 : vector<1x16xf32> to vector<1x16x1xf32>
    %106 = tpu.reciprocal %105 {approx = true} : vector<1x16x1xf32> -> vector<1x16x1xf32>
    %107 = vector.broadcast %106 : vector<1x16x1xf32> to vector<1x16x16xf32>
    %108 = arith.mulf %103, %107 : vector<1x16x16xf32>
    %109 = arith.truncf %108 : vector<1x16x16xf32> to vector<1x16x16xbf16>
    "tpu.trace_start"() <{level = 10 : i32, message = "bqk,bkd->bqd"}> : () -> ()
    %cst_31 = arith.constant dense<0.000000e+00> : vector<1x16x32xf32>
    %110 = tpu.matmul %109, %93, %cst_31 {dimension_numbers = #tpu.dot_dimension_numbers<[2], [1], [1], [2], [0, 0, 0, 1, 1, 2], [0], [0]>} : vector<1x16x16xbf16>, vector<1x16x32xbf16>, vector<1x16x32xf32> -> vector<1x16x32xf32>
    "tpu.trace_stop"() : () -> ()
    %111 = vector.shape_cast %110 : vector<1x16x32xf32> to vector<16x32xf32>
    %112 = tpu.concatenate %39, %63, %87, %111 in 1 : vector<16x32xf32>, vector<16x32xf32>, vector<16x32xf32>, vector<16x32xf32> -> vector<16x128xf32>
    %113 = arith.truncf %112 : vector<16x128xf32> to vector<16x128xbf16>
    %c0_32 = arith.constant 0 : index
    %c0_33 = arith.constant 0 : index
    %114 = vector.load %arg7[%c0_32, %c0_33] : memref<128x128xbf16, #tpu.memory_space<vmem>>, vector<128x128xbf16>
    %cst_34 = arith.constant dense<0.000000e+00> : vector<16x128xf32>
    %115 = tpu.matmul %113, %114, %cst_34 {dimension_numbers = #tpu.dot_dimension_numbers<[1], [0], [0], [1], [0, 0, 1, 1], [], []>} : vector<16x128xbf16>, vector<128x128xbf16>, vector<16x128xf32> -> vector<16x128xf32>
    %c0_35 = arith.constant 0 : index
    %c0_36 = arith.constant 0 : index
    %116 = vector.load %arg8[%c0_35, %c0_36] : memref<1x128xf32, #tpu.memory_space<vmem>>, vector<1x128xf32>
    %117 = vector.broadcast %116 : vector<1x128xf32> to vector<16x128xf32>
    %118 = arith.addf %115, %117 : vector<16x128xf32>
    %119 = vector.shape_cast %118 : vector<16x128xf32> to vector<1x16x128xf32>
    %120 = arith.addf %6, %119 : vector<1x16x128xf32>
    %c0_37 = arith.constant 0 : index
    %c0_38 = arith.constant 0 : index
    %c0_39 = arith.constant 0 : index
    %121 = vector.load %arg9[%c0_37, %c0_38, %c0_39] : memref<1x16x128xf32, #tpu.memory_space<vmem>>, vector<1x16x128xf32>
    tpu.vector_store %arg9[%c0_37, %c0_38, %c0_39], %120 {strides = array<i32>} : memref<1x16x128xf32, #tpu.memory_space<vmem>>, vector<1x16x128xf32>,
    return
  }
  func.func @transform_0(%arg0: i32) -> (i32, i32, i32) {
    %c0_i32 = arith.constant 0 : i32
    %c0_i32_0 = arith.constant 0 : i32
    %c0_i32_1 = arith.constant 0 : i32
    return %arg0, %c0_i32, %c0_i32_0 : i32, i32, i32
  }
  func.func @transform_1(%arg0: i32) -> (i32, i32) {
    %c0_i32 = arith.constant 0 : i32
    %c0_i32_0 = arith.constant 0 : i32
    %c0_i32_1 = arith.constant 0 : i32
    return %c0_i32, %c0_i32_0 : i32, i32
  }
  func.func @transform_2(%arg0: i32) -> (i32, i32) {
    %c0_i32 = arith.constant 0 : i32
    %c0_i32_0 = arith.constant 0 : i32
    %c0_i32_1 = arith.constant 0 : i32
    return %c0_i32, %c0_i32_0 : i32, i32
  }
  func.func @transform_3(%arg0: i32) -> (i32, i32) {
    %c0_i32 = arith.constant 0 : i32
    %c0_i32_0 = arith.constant 0 : i32
    %c0_i32_1 = arith.constant 0 : i32
    return %c0_i32, %c0_i32_0 : i32, i32
  }
  func.func @transform_4(%arg0: i32) -> (i32, i32) {
    %c0_i32 = arith.constant 0 : i32
    %c0_i32_0 = arith.constant 0 : i32
    %c0_i32_1 = arith.constant 0 : i32
    return %c0_i32, %c0_i32_0 : i32, i32
  }
  func.func @transform_5(%arg0: i32) -> (i32, i32) {
    %c0_i32 = arith.constant 0 : i32
    %c0_i32_0 = arith.constant 0 : i32
    %c0_i32_1 = arith.constant 0 : i32
    return %c0_i32, %c0_i32_0 : i32, i32
  }
  func.func @transform_6(%arg0: i32) -> (i32, i32) {
    %c0_i32 = arith.constant 0 : i32
    %c0_i32_0 = arith.constant 0 : i32
    %c0_i32_1 = arith.constant 0 : i32
    return %c0_i32, %c0_i32_0 : i32, i32
  }
  func.func @transform_7(%arg0: i32) -> (i32, i32) {
    %c0_i32 = arith.constant 0 : i32
    %c0_i32_0 = arith.constant 0 : i32
    %c0_i32_1 = arith.constant 0 : i32
    return %c0_i32, %c0_i32_0 : i32, i32
  }
  func.func @transform_8(%arg0: i32) -> (i32, i32, i32) {
    %c0_i32 = arith.constant 0 : i32
    %c0_i32_0 = arith.constant 0 : i32
    %c0_i32_1 = arith.constant 0 : i32
    return %arg0, %c0_i32, %c0_i32_0 : i32, i32, i32
  }
}

module attributes {stable_mosaic.version = 11 : i64} {
  func.func @_ffn_kernel(%arg0: i32, %arg1: i32, %arg2: memref<1x16x128xf32, #tpu.memory_space<vmem>>, %arg3: memref<16x128xf32, #tpu.memory_space<vmem>>, %arg4: memref<16x128xf32, #tpu.memory_space<vmem>>, %arg5: memref<128x256xbf16, #tpu.memory_space<vmem>>, %arg6: memref<1x256xf32, #tpu.memory_space<vmem>>, %arg7: memref<256x128xbf16, #tpu.memory_space<vmem>>, %arg8: memref<1x128xf32, #tpu.memory_space<vmem>>, %arg9: memref<1x16x128xf32, #tpu.memory_space<vmem>>, %arg10: memref<1x16x128xf32, #tpu.memory_space<vmem>>, %arg11: memref<16x128xbf16, #tpu.memory_space<vmem>>) attributes {dimension_semantics = [#tpu.dimension_semantics<parallel>, #tpu.dimension_semantics<arbitrary>], iteration_bounds = array<i64: 2, 1>, scalar_prefetch = 0 : i64, scratch_operands = 2 : i64, tpu.core_type = #tpu.core_type<tc>, window_params = [{transform_indices = @transform_0, window_bounds = array<i64: 1, 16, 128>}, {pipeline_mode = #tpu.pipeline_mode<synchronous>, transform_indices = @transform_1, window_bounds = array<i64: 16, 128>}, {pipeline_mode = #tpu.pipeline_mode<synchronous>, transform_indices = @transform_2, window_bounds = array<i64: 16, 128>}, {transform_indices = @transform_3, window_bounds = array<i64: 128, 256>}, {transform_indices = @transform_4, window_bounds = array<i64: 1, 256>}, {transform_indices = @transform_5, window_bounds = array<i64: 256, 128>}, {pipeline_mode = #tpu.pipeline_mode<synchronous>, transform_indices = @transform_6, window_bounds = array<i64: 1, 128>}, {transform_indices = @transform_7, window_bounds = array<i64: 1, 16, 128>}]} {
    %c0_i32 = arith.constant 0 : i32
    %0 = arith.cmpi eq, %arg1, %c0_i32 : i32
    %1 = arith.extui %0 : i1 to i32
    %c0_i32_0 = arith.constant 0 : i32
    %2 = arith.cmpi ne, %1, %c0_i32_0 : i32
    scf.if %2 {
      %c0_14 = arith.constant 0 : index
      %c0_15 = arith.constant 0 : index
      %c0_16 = arith.constant 0 : index
      %21 = vector.load %arg2[%c0_14, %c0_15, %c0_16] : memref<1x16x128xf32, #tpu.memory_space<vmem>>, vector<1x16x128xf32>
      %c0_17 = arith.constant 0 : index
      %c0_18 = arith.constant 0 : index
      %22 = vector.load %arg3[%c0_17, %c0_18] : memref<16x128xf32, #tpu.memory_space<vmem>>, vector<16x128xf32>
      %23 = vector.shape_cast %22 : vector<16x128xf32> to vector<1x16x128xf32>
      %24 = arith.mulf %21, %23 : vector<1x16x128xf32>
      %c0_19 = arith.constant 0 : index
      %c0_20 = arith.constant 0 : index
      %25 = vector.load %arg4[%c0_19, %c0_20] : memref<16x128xf32, #tpu.memory_space<vmem>>, vector<16x128xf32>
      %26 = vector.shape_cast %25 : vector<16x128xf32> to vector<1x16x128xf32>
      %27 = arith.addf %24, %26 : vector<1x16x128xf32>
      %c0_21 = arith.constant 0 : index
      %c0_22 = arith.constant 0 : index
      %c0_23 = arith.constant 0 : index
      %28 = vector.load %arg10[%c0_21, %c0_22, %c0_23] : memref<1x16x128xf32, #tpu.memory_space<vmem>>, vector<1x16x128xf32>
      tpu.vector_store %arg10[%c0_21, %c0_22, %c0_23], %27 {strides = array<i32>} : memref<1x16x128xf32, #tpu.memory_space<vmem>>, vector<1x16x128xf32>,
      %29 = vector.shape_cast %27 : vector<1x16x128xf32> to vector<16x128xf32>
      %30 = arith.truncf %29 : vector<16x128xf32> to vector<16x128xbf16>
      %c0_24 = arith.constant 0 : index
      %c0_25 = arith.constant 0 : index
      %31 = vector.load %arg11[%c0_24, %c0_25] : memref<16x128xbf16, #tpu.memory_space<vmem>>, vector<16x128xbf16>
      tpu.vector_store %arg11[%c0_24, %c0_25], %30 {strides = array<i32>} : memref<16x128xbf16, #tpu.memory_space<vmem>>, vector<16x128xbf16>,
    } else {
    }
    %c0 = arith.constant 0 : index
    %c0_1 = arith.constant 0 : index
    %3 = vector.load %arg11[%c0, %c0_1] : memref<16x128xbf16, #tpu.memory_space<vmem>>, vector<16x128xbf16>
    %c0_2 = arith.constant 0 : index
    %c0_3 = arith.constant 0 : index
    %4 = vector.load %arg5[%c0_2, %c0_3] : memref<128x256xbf16, #tpu.memory_space<vmem>>, vector<128x256xbf16>
    %cst = arith.constant dense<0.000000e+00> : vector<16x256xf32>
    %5 = tpu.matmul %3, %4, %cst {dimension_numbers = #tpu.dot_dimension_numbers<[1], [0], [0], [1], [0, 0, 1, 1], [], []>} : vector<16x128xbf16>, vector<128x256xbf16>, vector<16x256xf32> -> vector<16x256xf32>
    %c0_4 = arith.constant 0 : index
    %c0_5 = arith.constant 0 : index
    %6 = vector.load %arg6[%c0_4, %c0_5] : memref<1x256xf32, #tpu.memory_space<vmem>>, vector<1x256xf32>
    %7 = vector.broadcast %6 : vector<1x256xf32> to vector<16x256xf32>
    %8 = arith.addf %5, %7 : vector<16x256xf32>
    %cst_6 = arith.constant 0.000000e+00 : f32
    %9 = vector.broadcast %cst_6 : f32 to vector<16x256xf32>
    %10 = arith.maximumf %8, %9 : vector<16x256xf32>
    %11 = arith.truncf %10 : vector<16x256xf32> to vector<16x256xbf16>
    %c0_7 = arith.constant 0 : index
    %c0_8 = arith.constant 0 : index
    %12 = vector.load %arg7[%c0_7, %c0_8] : memref<256x128xbf16, #tpu.memory_space<vmem>>, vector<256x128xbf16>
    %cst_9 = arith.constant dense<0.000000e+00> : vector<16x128xf32>
    %13 = tpu.matmul %11, %12, %cst_9 {dimension_numbers = #tpu.dot_dimension_numbers<[1], [0], [0], [1], [0, 0, 1, 1], [], []>} : vector<16x256xbf16>, vector<256x128xbf16>, vector<16x128xf32> -> vector<16x128xf32>
    %14 = vector.shape_cast %13 : vector<16x128xf32> to vector<1x16x128xf32>
    %c0_i32_10 = arith.constant 0 : i32
    %15 = arith.cmpi eq, %arg1, %c0_i32_10 : i32
    %16 = arith.extui %15 : i1 to i32
    %c0_i32_11 = arith.constant 0 : i32
    %17 = arith.cmpi ne, %16, %c0_i32_11 : i32
    scf.if %17 {
      %c0_14 = arith.constant 0 : index
      %c0_15 = arith.constant 0 : index
      %c0_16 = arith.constant 0 : index
      %21 = vector.load %arg10[%c0_14, %c0_15, %c0_16] : memref<1x16x128xf32, #tpu.memory_space<vmem>>, vector<1x16x128xf32>
      %c0_17 = arith.constant 0 : index
      %c0_18 = arith.constant 0 : index
      %22 = vector.load %arg8[%c0_17, %c0_18] : memref<1x128xf32, #tpu.memory_space<vmem>>, vector<1x128xf32>
      %23 = vector.shape_cast %22 : vector<1x128xf32> to vector<1x1x128xf32>
      %24 = vector.broadcast %23 : vector<1x1x128xf32> to vector<1x16x128xf32>
      %25 = arith.addf %21, %24 : vector<1x16x128xf32>
      %26 = arith.addf %25, %14 : vector<1x16x128xf32>
      %c0_19 = arith.constant 0 : index
      %c0_20 = arith.constant 0 : index
      %c0_21 = arith.constant 0 : index
      %27 = vector.load %arg9[%c0_19, %c0_20, %c0_21] : memref<1x16x128xf32, #tpu.memory_space<vmem>>, vector<1x16x128xf32>
      tpu.vector_store %arg9[%c0_19, %c0_20, %c0_21], %26 {strides = array<i32>} : memref<1x16x128xf32, #tpu.memory_space<vmem>>, vector<1x16x128xf32>,
    } else {
    }
    %c0_i32_12 = arith.constant 0 : i32
    %18 = arith.cmpi ne, %arg1, %c0_i32_12 : i32
    %19 = arith.extui %18 : i1 to i32
    %c0_i32_13 = arith.constant 0 : i32
    %20 = arith.cmpi ne, %19, %c0_i32_13 : i32
    scf.if %20 {
      %c0_14 = arith.constant 0 : index
      %c0_15 = arith.constant 0 : index
      %c0_16 = arith.constant 0 : index
      %21 = vector.load %arg9[%c0_14, %c0_15, %c0_16] : memref<1x16x128xf32, #tpu.memory_space<vmem>>, vector<1x16x128xf32>
      %22 = arith.addf %21, %14 : vector<1x16x128xf32>
      %c0_17 = arith.constant 0 : index
      %c0_18 = arith.constant 0 : index
      %c0_19 = arith.constant 0 : index
      %23 = vector.load %arg9[%c0_17, %c0_18, %c0_19] : memref<1x16x128xf32, #tpu.memory_space<vmem>>, vector<1x16x128xf32>
      tpu.vector_store %arg9[%c0_17, %c0_18, %c0_19], %22 {strides = array<i32>} : memref<1x16x128xf32, #tpu.memory_space<vmem>>, vector<1x16x128xf32>,
    } else {
    }
    return
  }
  func.func @transform_0(%arg0: i32, %arg1: i32) -> (i32, i32, i32) {
    %c0_i32 = arith.constant 0 : i32
    %c0_i32_0 = arith.constant 0 : i32
    %c0_i32_1 = arith.constant 0 : i32
    return %arg0, %c0_i32, %c0_i32_0 : i32, i32, i32
  }
  func.func @transform_1(%arg0: i32, %arg1: i32) -> (i32, i32) {
    %c0_i32 = arith.constant 0 : i32
    %c0_i32_0 = arith.constant 0 : i32
    %c0_i32_1 = arith.constant 0 : i32
    return %c0_i32, %c0_i32_0 : i32, i32
  }
  func.func @transform_2(%arg0: i32, %arg1: i32) -> (i32, i32) {
    %c0_i32 = arith.constant 0 : i32
    %c0_i32_0 = arith.constant 0 : i32
    %c0_i32_1 = arith.constant 0 : i32
    return %c0_i32, %c0_i32_0 : i32, i32
  }
  func.func @transform_3(%arg0: i32, %arg1: i32) -> (i32, i32) {
    %c0_i32 = arith.constant 0 : i32
    %c0_i32_0 = arith.constant 0 : i32
    return %c0_i32, %arg1 : i32, i32
  }
  func.func @transform_4(%arg0: i32, %arg1: i32) -> (i32, i32) {
    %c0_i32 = arith.constant 0 : i32
    %c0_i32_0 = arith.constant 0 : i32
    return %c0_i32, %arg1 : i32, i32
  }
  func.func @transform_5(%arg0: i32, %arg1: i32) -> (i32, i32) {
    %c0_i32 = arith.constant 0 : i32
    %c0_i32_0 = arith.constant 0 : i32
    return %arg1, %c0_i32 : i32, i32
  }
  func.func @transform_6(%arg0: i32, %arg1: i32) -> (i32, i32) {
    %c0_i32 = arith.constant 0 : i32
    %c0_i32_0 = arith.constant 0 : i32
    %c0_i32_1 = arith.constant 0 : i32
    return %c0_i32, %c0_i32_0 : i32, i32
  }
  func.func @transform_7(%arg0: i32, %arg1: i32) -> (i32, i32, i32) {
    %c0_i32 = arith.constant 0 : i32
    %c0_i32_0 = arith.constant 0 : i32
    %c0_i32_1 = arith.constant 0 : i32
    return %arg0, %c0_i32, %c0_i32_0 : i32, i32, i32
  }
}

</mosaic_0001>

<bundles_post_ra>
// kernel: encoder_layer.4
= control target key start
LH: loop header
LB: loop body
LE: loop exit
PB: predicated region body
PF: predicated region fallthrough
CT: control target
= control target key end

     0   :  { %s235_s9 = smov 0   ;;  %s285_s0 = inlined_call_operand.vmem [shape: f32[2,16,128], index: 0, kind: input, shape index: {}]   ;;  %s286_s1 = inlined_call_operand.vmem [shape: f32[16,128], index: 1, kind: output, shape index: {0}]   ;;  %s287_s2 = inlined_call_operand.vmem [shape: f32[16,128], index: 2, kind: output, shape index: {1}]  }
   0x1 LB: > { %s193_s10 = sadd.s32 4294967295, %s218_s9   ;;  %p196_p0 = scmp.ge.s32.totalorder %s218_s9, 1  ;;  %s218_s9 = sphi %s235_s9, %s13_s9  }
   0x2   : > { %p105_p1 = scmp.lt.s32.totalorder %s218_s9, 3 }
   0x4   : > { %p106_p2 = pnand %p196_p0, %p105_p1 }
   0x5   : > { %p122_p3 = scmp.lt.s32.totalorder (!%p106_p2), %s193_s10, 1  ;;  %p199_p4 = scmp.ne.s32.totalorder (!%p106_p2), %s193_s10, 0 }
   0x6   : > { %109 = sbr.rel (%p106_p2) target bundleno = 31 (0x1f), region = 24 }
   0xd   : > { %s123_s11 = scalar_select %p122_p3, %s193_s10, 1 }
   0xe   : > { %138 = sbr.rel (%p199_p4) target bundleno = 21 (0x15), region = 28 }
   0xf   : > { %s203_s12 = sshll.u32 %s123_s11, 4 }
  0x10   : > { %s126_s15 = scalar_lea.vmem %s285_s0, %s203_s12 }
  0x11   : > { %v127_v0 = vld [vmem:[%s126_s15] sm:$0xff]  ;;  %v128_v1 = vld [vmem:[%s126_s15 + $0x8] sm:$0xff] }
  0x12   : > { %v131_v2 = vmul.f32 %v127_v0, %v127_v0  ;;  %v132_v3 = vmul.f32 %v128_v1, %v128_v1  ;;  %139 = vst [vmem:[%s286_s1] sm:$0xff] (!%p199_p4), %v127_v0  ;;  %140 = vst [vmem:[%s286_s1 + $0x8] sm:$0xff] (!%p199_p4), %v128_v1 }
  0x14   : > { %141 = vst [vmem:[%s287_s2] sm:$0xff] (!%p199_p4), %v131_v2  ;;  %142 = vst [vmem:[%s287_s2 + $0x8] sm:$0xff] (!%p199_p4), %v132_v3 }
  0x15 PF: > { %p200_p5 = scmp.eq.s32.totalorder %s193_s10, 0 }
  0x17   : > { %146 = sbr.rel (%p200_p5) target bundleno = 31 (0x1f), region = 32 }
  0x19   : > { %v147_v4 = vld [vmem:[%s286_s1] sm:$0xff] (!%p200_p5)  ;;  %v148_v5 = vld [vmem:[%s286_s1 + $0x8] sm:$0xff] (!%p200_p5) }
  0x1a   : > { %v149_v7 = vadd.f32 (!%p200_p5), %v147_v4, %v127_v0  ;;  %v150_v8 = vadd.f32 (!%p200_p5), %v148_v5, %v128_v1 }
  0x1b   : > { %v153_v6 = vld [vmem:[%s287_s2] sm:$0xff] (!%p200_p5)  ;;  %v154_v10 = vld [vmem:[%s287_s2 + $0x8] sm:$0xff] (!%p200_p5) }
  0x1c   : > { %v155_v9 = vadd.f32 (!%p200_p5), %v153_v6, %v131_v2  ;;  %v156_v11 = vadd.f32 (!%p200_p5), %v154_v10, %v132_v3  ;;  %151 = vst [vmem:[%s286_s1] sm:$0xff] (!%p200_p5), %v149_v7  ;;  %152 = vst [vmem:[%s286_s1 + $0x8] sm:$0xff] (!%p200_p5), %v150_v8 }
  0x1e   : > { %157 = vst [vmem:[%s287_s2] sm:$0xff] %v155_v9  ;;  %158 = vst [vmem:[%s287_s2 + $0x8] sm:$0xff] %v156_v11 }
  0x1f PF: > { %s13_s9 = sadd.s32 1, %s218_s9  }
  0x20   : > { %p10_p6 = scmp.ge.s32.totalorder %s13_s9, 4  }
  0x22   :  { %12 = sbr.rel (!%p10_p6) target bundleno = 1 (0x1), region = 66 }

// kernel: encoder_layer.7
= control target key start
LH: loop header
LB: loop body
LE: loop exit
PB: predicated region body
PF: predicated region fallthrough
CT: control target
= control target key end

     0   :  { %12 = vsyncpa [#allocation5], 0  ;;  %s1376_s0 = inlined_call_operand.vmem [shape: f32[2,16,128], index: 0, kind: input, shape index: {}]   ;;  %s1377_s1 = inlined_call_operand.vmem [shape: f32[16,128], index: 1, kind: input, shape index: {}]   ;;  %s1378_s2 = inlined_call_operand.vmem [shape: f32[16,128], index: 2, kind: input, shape index: {}]   ;;  %s1379_s3 = inlined_call_operand.vmem [shape: bf16[128,256], index: 3, kind: input, shape index: {}]   ;;  %s1380_s4 = inlined_call_operand.vmem [shape: f32[1,256], index: 4, kind: input, shape index: {}]   ;;  %s1381_s5 = inlined_call_operand.vmem [shape: bf16[256,128], index: 5, kind: input, shape index: {}]   ;;  %s1382_s6 = inlined_call_operand.vmem [shape: f32[1,128], index: 6, kind: input, shape index: {}]   ;;  %s1383_s7 = inlined_call_operand.hbm [shape: f32[2,16,128], index: 7, kind: output, shape index: {}]  }
   0x1   :  { %14 = vsyncpa [#allocation5 + $0x1], 0  ;;  %s1147_s24 = smov 0   ;;  %s1149_s25 = smov 0  }
   0x2   :  { %s1151_s26 = smov 0   ;;  %s1153_s27 = smov 0  }
   0x3   :  { %s1155_s28 = smov 0   ;;  %s1157_s29 = smov 0  }
   0x4 LB: > { %s852_s30 = sadd.s32 4294967295, %s1101_s29   ;;  %s853_s8 = sadd.s32 4294967294, %s1101_s29   ;;  %s1101_s29 = sphi %s1157_s29, %s20_s29   ;;  %s1097_s28 = sphi %s1155_s28, %s1393_s28   ;;  %s1093_s27 = sphi %s1153_s27, %s1392_s27   ;;  %s1089_s26 = sphi %s1151_s26, %s1391_s26   ;;  %s1085_s25 = sphi %s1149_s25, %s1390_s25   ;;  %s1081_s24 = sphi %s1147_s24, %s1389_s24  }
   0x5   : > { %s32_s9 = sadd.s32 1, %s1097_s28  ;;  %s206_s10 = sadd.s32 1, %s1089_s26 }
   0x6   : > { %p34_p0 = scmp.ge.s32.totalorder %s32_s9, 2  ;;  %p216_p1 = scmp.ne.s32.totalorder %s1089_s26, %s1085_s25 }
   0x7   : > { %p217_p2 = scmp.eq.s32.totalorder %s852_s30, 1  ;;  %p222_p3 = scmp.ne.s32.totalorder %s1085_s25, %s1081_s24 }
   0x8   : > { %s1395_s9 = smov (%p34_p0, %s32_s9), 0  ;;  %p223_p5 = scmp.eq.s32.totalorder %s853_s8, 1 }
   0x9   : > { %1385 = sst [smem:[#allocation7_spill]] %s1395_s9  ;;  %p1187_p4 = por %p217_p2, %p216_p1 }
   0xa   : > { %s203_s12 = ssub.s32 %s1097_s28, %s1395_s9  ;;  %p859_p6 = scmp.ge.s32.totalorder %s1101_s29, 1 }
   0xb   : > { %p204_p7 = scmp.eq.s32.totalorder %s203_s12, 0  ;;  %p1194_p8 = por %p223_p5, %p222_p3 }
   0xc   : > { %p284_p9 = scmp.lt.s32.totalorder %s1101_s29, 3 }
   0xd   : > { %s1200_s14 = scalar_select %p204_p7, %s1089_s26, %s206_s10  }
   0xe   : > { %p285_p10 = pnand %p859_p6, %p284_p9 }
   0xf   : > { %v983_v0 = vld [vmem:[%s1379_s3 + $0x4] ss:$8 sps:$4 sm:$0xff] (!%p285_p10)   ;;  %v985_v1 = vld [vmem:[%s1379_s3] ss:$8 sps:$4 sm:$0xff] (!%p285_p10)   ;;  %v1103_v2 = vmov (!%p285_p10), 0   ;;  %p330_p11 = scmp.lt.s32.totalorder (!%p285_p10), %s1093_s27, 1  ;;  %v390_v44 = vlaneseq (!%p285_p10) }
  0x10   : > { %288 = sbr.rel (%p285_p10) target bundleno = 504 (0x1f8), region = 48  ;;  %512 = vmatprep.mubr.bf16.mxu0 (!%p285_p10), %v1103_v2  ;;  %480 = vmatprep.subr.bf16.mxu0 (!%p285_p10), %v983_v0  ;;  %v986_v3 = vld [vmem:[%s1379_s3 + $0x14] ss:$8 sps:$4 sm:$0xff] (!%p285_p10)   ;;  %v988_v4 = vld [vmem:[%s1379_s3 + $0x10] ss:$8 sps:$4 sm:$0xff] (!%p285_p10)   ;;  %v1007_v11 = vld [vmem:[%s1381_s5 + $0x40] sm:$0xff] (!%p285_p10)  }
  0x11   : > { %481 = vmatpush1.bf16.msra.mxu0 (!%p285_p10), %v985_v1  ;;  %v989_v5 = vld [vmem:[%s1379_s3 + $0x24] ss:$8 sps:$4 sm:$0xff] (!%p285_p10)   ;;  %v991_v6 = vld [vmem:[%s1379_s3 + $0x20] ss:$8 sps:$4 sm:$0xff] (!%p285_p10)   ;;  %v992_v7 = vld [vmem:[%s1379_s3 + $0x34] ss:$8 sps:$4 sm:$0xff] (!%p285_p10)   ;;  %903 = vmatprep.subr.bf16.mxu1 (!%p285_p10), %v1007_v11 }
  0x12   : > { %482 = vmatprep.subr.bf16.mxu0 (!%p285_p10), %v986_v3  ;;  %v994_v8 = vld [vmem:[%s1379_s3 + $0x30] ss:$8 sps:$4 sm:$0xff] (!%p285_p10)   ;;  %v995_v9 = vld [vmem:[%s1379_s3 + $0x44] ss:$8 sps:$4 sm:$0xff] (!%p285_p10)   ;;  %v997_v10 = vld [vmem:[%s1379_s3 + $0x40] ss:$8 sps:$4 sm:$0xff] (!%p285_p10)  }
  0x13   : > { %v998_v12 = vld [vmem:[%s1379_s3 + $0x54] ss:$8 sps:$4 sm:$0xff] (!%p285_p10)   ;;  %v1008_v13 = vld [vmem:[%s1381_s5] sm:$0xff] (!%p285_p10)   ;;  %v1009_v14 = vld [vmem:[%s1381_s5 + $0x48] sm:$0xff] (!%p285_p10)   ;;  %v391_v45 = vshrl.u32 (!%p285_p10), %v390_v44, 7  ;;  %s327_s9 = sand.u32 (!%p285_p10), 1, %s1085_s25  }
  0x14   : > { %904 = vmatpush3.bf16.msra.mxu1 (!%p285_p10), %v1008_v13  ;;  %v1010_v15 = vld [vmem:[%s1381_s5 + $0x8] sm:$0xff] (!%p285_p10)   ;;  %v1000_v16 = vld [vmem:[%s1379_s3 + $0x50] ss:$8 sps:$4 sm:$0xff] (!%p285_p10)   ;;  %v359_v21 = vld [vmem:[%s1377_s1] sm:$0xff] (!%p285_p10)  ;;  %s902_s18 = sshll.u32 (!%p285_p10), %s1093_s27, 8  ;;  %s1330_s22 = scalar_lea.sflag (!%p285_p10), [#allocation5], %s327_s9 }
  0x15   : > { %483 = vmatpush1.bf16.msra.mxu0 (!%p285_p10), %v988_v4  ;;  %905 = vmatprep.subr.bf16.mxu1 (!%p285_p10), %v1009_v14  ;;  %v1011_v19 = vld [vmem:[%s1381_s5 + $0x50] sm:$0xff] (!%p285_p10)   ;;  %v1001_v20 = vld [vmem:[%s1379_s3 + $0x64] ss:$8 sps:$4 sm:$0xff] (!%p285_p10)   ;;  %v1003_v24 = vld [vmem:[%s1379_s3 + $0x60] ss:$8 sps:$4 sm:$0xff] (!%p285_p10)   ;;  %v392_v46 = vsub.s32 (!%p285_p10), 0, %v391_v45  ;;  %s1328_s21 = scalar_lea.hbm (!%p285_p10), %s1383_s7, %s902_s18 }
  0x16   : > { %484 = vmatprep.subr.bf16.mxu0 (!%p285_p10), %v989_v5  ;;  %v360_v22 = vld [vmem:[%s1377_s1 + $0x8] sm:$0xff] (!%p285_p10)  ;;  %v1012_v23 = vld [vmem:[%s1381_s5 + $0x10] sm:$0xff] (!%p285_p10)   ;;  %v363_v25 = vld [vmem:[%s1378_s2] sm:$0xff] (!%p285_p10)  ;;  %v396_v48 = vsub.s32 (!%p285_p10), 1, %v391_v45 }
  0x17   : > { %s331_s12 = scalar_select %p330_p11, %s1093_s27, 1  ;;  %v1013_v26 = vld [vmem:[%s1381_s5 + $0x58] sm:$0xff]   ;;  %v364_v30 = vld [vmem:[%s1378_s2 + $0x8] sm:$0xff]  ;;  %v1015_v32 = vld [vmem:[%s1381_s5 + $0x60] sm:$0xff]  }
  0x18   : > { %906 = vmatpush3.bf16.msra.mxu1 %v1010_v15  ;;  %v1004_v27 = vld [vmem:[%s1379_s3 + $0x74] ss:$8 sps:$4 sm:$0xff]   ;;  %v1006_v35 = vld [vmem:[%s1379_s3 + $0x70] ss:$8 sps:$4 sm:$0xff]   ;;  %v1016_v36 = vld [vmem:[%s1381_s5 + $0x20] sm:$0xff]   ;;  %s1104_s27 = smov [#allocation4]  }
  0x19   : > { %485 = vmatpush1.bf16.msra.mxu0 %v991_v6  ;;  %s901_s19 = sshll.u32 %s331_s12, 4  ;;  %907 = vmatprep.subr.bf16.mxu1 %v1011_v19  ;;  %v1014_v31 = vld [vmem:[%s1381_s5 + $0x18] sm:$0xff]   ;;  %v1017_v37 = vld [vmem:[%s1381_s5 + $0x68] sm:$0xff]   ;;  %v1019_v40 = vld [vmem:[%s1381_s5 + $0x70] sm:$0xff]   ;;  %s1027_s30 = sshll.u32 %s1104_s27, 4  ;;  %s1028_s30 = int_to_ptr.vmem [resolvable:$false] %s1027_s30 }
  0x1a   : > { %486 = vmatprep.subr.bf16.mxu0 %v992_v7  ;;  %s334_s12 = scalar_lea.vmem %s1376_s0, %s901_s19  ;;  %v1018_v39 = vld [vmem:[%s1381_s5 + $0x28] sm:$0xff]   ;;  %v1020_v41 = vld [vmem:[%s1381_s5 + $0x30] sm:$0xff]   ;;  %v1021_v42 = vld [vmem:[%s1381_s5 + $0x78] sm:$0xff]   ;;  %s860_s19 = sshll.u32 %s327_s9, 4 }
  0x1b   : > { %v357_v17 = vld [vmem:[%s334_s12] sm:$0xff]  ;;  %v358_v18 = vld [vmem:[%s334_s12 + $0x8] sm:$0xff]  ;;  %v1022_v43 = vld [vmem:[%s1381_s5 + $0x38] sm:$0xff]   ;;  %s329_s16 = scalar_lea.vmem [#allocation4], %s860_s19  ;;  %s1029_s8 = scalar_lea.vmem %s1028_s30, 512 }
  0x1c   : > { %v361_v28 = vmul.f32 %v359_v21, %v357_v17  ;;  %v362_v29 = vmul.f32 %v360_v22, %v358_v18  ;;  %908 = vmatpush3.bf16.msra.mxu1 %v1012_v23  ;;  %v388_v47 = vld [vmem:[%s1380_s4] sm:$0x3]  ;;  %s740_s17 = sshll.u32 %s329_s16, 4  ;;  %s1323_s17 = int_to_ptr.vmem [resolvable:$true] %s740_s17 }
  0x1d   : > { %487 = vmatpush1.bf16.msra.mxu0 %v994_v8  ;;  %909 = vmatprep.subr.bf16.mxu1 %v1013_v26  ;;  %v393_v49 = vrot.slane %v388_v47, %v392_v46  ;;  %v397_v50 = vrot.slane %v388_v47, %v396_v48  ;;  %v895_v1 = vld [vmem:[%s1382_s6] ss:$0 sm:$0xff]  ;;  %s1023_s23 = scalar_lea.vmem %s1323_s17, 256  ;;  %p1030_p1 = scmp.lt.s32.totalorder %s1323_s17, %s1028_s30 }
  0x1e   : > { %488 = vmatprep.subr.bf16.mxu0 %v995_v9  ;;  %v365_v33 = vadd.f32 %v363_v25, %v361_v28  ;;  %v366_v34 = vadd.f32 %v364_v30, %v362_v29  ;;  %p1024_p12 = scmp.ne.s32.totalorder %s1323_s17, %s1023_s23  ;;  %p1031_p2 = scmp.lt.s32.totalorder %s1029_s8, %s1023_s23 }
  0x20   : > { %910 = vmatpush3.bf16.msra.mxu1 %v1014_v31  ;;  %v369_v38 = vpack.c.bf16 %v366_v34, %v365_v33  ;;  %v710_v3 = vadd.f32 %v895_v1, %v365_v33  ;;  %v711_v7 = vadd.f32 %v895_v1, %v366_v34  ;;  %p1025_p13 = pnand %p1024_p12, %p1187_p4  ;;  %p1032_p3 = por %p1031_p2, %p1030_p1 }
  0x21   : > { %489 = vmatpush1.bf16.msra.mxu0 %v997_v10  ;;  %911 = vmatprep.subr.bf16.mxu1 %v1015_v32 }
  0x22   : > { %490 = vmatprep.subr.bf16.mxu0 %v998_v12  ;;  %p1026_p0 = pneg %p1025_p13 }
  0x24   : > { %912 = vmatpush3.bf16.msra.mxu1 %v1016_v36  ;;  %p1033_p5 = pnand %p1032_p3, %p1026_p0 }
  0x25   : > { %491 = vmatpush1.bf16.msra.mxu0 %v1000_v16  ;;  %913 = vmatprep.subr.bf16.mxu1 %v1017_v37 }
  0x26   : > { %492 = vmatprep.subr.bf16.mxu0 %v1001_v20 }
  0x28   : > { %914 = vmatpush3.bf16.msra.mxu1 %v1018_v39 }
  0x29   : > { %493 = vmatpush1.bf16.msra.mxu0 %v1003_v24  ;;  %915 = vmatprep.subr.bf16.mxu1 %v1019_v40 }
  0x2a   : > { %494 = vmatprep.subr.bf16.mxu0 %v1004_v27 }
  0x2c   : > { %916 = vmatpush3.bf16.msra.mxu1 %v1020_v41 }
  0x2d   : > { %495 = vmatpush1.bf16.msra.mxu0 %v1006_v35  ;;  %917 = vmatprep.subr.bf16.mxu1 %v1021_v42 }
  0x30   : > { %513 = vmatmul.mubr.bf16.vlgmr.msra.gmra.mrb[0].mxu0 %v369_v38  ;;  %918 = vmatpush3.bf16.msra.mxu1 %v1022_v43 }
 0x103   : > { %v514_v51 = vpop.f32.mrb[0].mxu0 }
 0x104   : > { %v515_v52 = vadd.f32 %v514_v51, %v393_v49  ;;  %v516_v53 = vpop.f32.mrb[1].mxu0 }
 0x105   : > { %v517_v54 = vadd.f32 %v516_v53, %v397_v50  ;;  %v518_v55 = vpop.f32.mrb[2].mxu0 }
 0x106   : > { %v519_v56 = vadd.f32 %v518_v55, %v393_v49  ;;  %v520_v57 = vpop.f32.mrb[3].mxu0  ;;  %v523_v59 = vmax.f32 %v515_v52, 0.0 }
 0x107   : > { %v521_v58 = vadd.f32 %v520_v57, %v397_v50  ;;  %v524_v61 = vmax.f32 %v517_v54, 0.0 }
 0x108   : > { %v525_v60 = vmax.f32 %v519_v56, 0.0 }
 0x109   : > { %v526_v62 = vmax.f32 %v521_v58, 0.0 }
 0x10a   : > { %v527_v63 = vpack.c.bf16 %v525_v60, %v523_v59 }
 0x10b   : > { %v528_v0 = vpack.c.bf16 %v526_v62, %v524_v61 }
 0x10d   : > { %689 = vmatprep.mubr.bf16.mxu1 %v528_v0 }
 0x10e   : > { %690 = vmatmul.mubr.bf16.vlgmr.msra.gmra.mrb[0].mxu1 %v527_v63 }
 0x1e1   : > { %v919_v2 = vpop.f32.mrb[0].mxu1 }
 0x1e2   : > { %v920_v4 = vpop.f32.mrb[1].mxu1 }
 0x1e3   : > { %v921_v5 = vadd.f32 %v920_v4, %v919_v2  ;;  %v922_v6 = vpop.f32.mrb[2].mxu1 }
 0x1e4   : > { %v923_v8 = vpop.f32.mrb[3].mxu1 }
 0x1e5   : > { %v712_v9 = vadd.f32 %v921_v5, %v710_v3  ;;  %v924_v10 = vadd.f32 %v923_v8, %v922_v6 }
 0x1e7   : > { %714 = vst [vmem:[%s329_s16] sm:$0xff] %v712_v9  ;;  %v713_v11 = vadd.f32 %v924_v10, %v711_v7 }
 0x1e9   : > { %715 = vst [vmem:[%s329_s16 + $0x8] sm:$0xff] %v713_v11 }
 0x1ea   : > { %1036 = shalt.err (!%p1033_p5)
}
 0x1eb   : > { %s1037_s9 = scalar_lea.hbm %s1328_s21, 256  ;;  %s1041_s15 = scalar_lea.hbm %s1383_s7, 512 }
 0x1ec   : > { %p1038_p6 = scmp.ne.s32.totalorder %s1328_s21, %s1037_s9  ;;  %p1042_p10 = scmp.lt.u32.totalorder %s1328_s21, %s1383_s7 }
 0x1ed   : > { %p1043_p11 = scmp.lt.u32.totalorder %s1041_s15, %s1037_s9  ;;  %p1045_p13 = scmp.lt.u32.totalorder %s1037_s9, %s1328_s21 }
 0x1ee   : > { %p1039_p7 = pnand %p1038_p6, %p1187_p4 }
 0x1ef   : > { %p1044_p12 = por %p1043_p11, %p1042_p10 }
 0x1f0   : > { %p1040_p9 = pneg %p1039_p7 }
 0x1f1   : > { %p1046_p0 = por %p1045_p13, %p1044_p12 }
 0x1f3   : > { %p1047_p1 = pnand %p1046_p0, %p1040_p9 }
 0x1f5   : > { %1050 = shalt.err (!%p1047_p1)
}
 0x1f6   : > { %s1105_s20 = smov 128   ;;  %s1106_s12 = smov 8  }
 0x1f7   : > { %925 = dma.vmem_to_hbm [thread:$0]  (%p1187_p4), %s1323_s17, 256, %s1328_s21, %s1330_s22, %s1105_s20, %s1105_s20, %s1106_s12  }
 0x1f8 PF: > { %p931_p2 = scmp.ge.s32.totalorder %s1101_s29, 2  ;;  %s755_s23 = sand.u32 1, %s1081_s24  }
 0x1f9   : > { %s756_s27 = scalar_lea.sflag [#allocation5], %s755_s23 }
 0x1fa   : > { %p928_p3 = pnand %p931_p2, %p1194_p8 }
 0x1fc   : > { %1076 = dma.done.wait (!%p928_p3), %s756_s27, 256  }
 0x1fd   : > { %1078 = vsyncadd (!%p928_p3), %s756_s27, 4294967040  ;;  %s20_s29 = sadd.s32 1, %s1101_s29   ;;  %s1388_s11 = sld [smem:[#allocation7_spill]] }
 0x1fe   : > { %p17_p5 = scmp.ge.s32.totalorder %s20_s29, 4   ;;  %s1389_s24 = smov %s1085_s25 }
 0x1ff   : > { %s1390_s25 = smov %s1089_s26  ;;  %s1391_s26 = smov %s1200_s14 }
 0x200   : > { %s1392_s27 = smov %s1097_s28  ;;  %19 = sbr.rel (!%p17_p5) target bundleno = 4 (0x4), region = 104 }
 0x203   : > { %s1393_s28 = smov %s1388_s11 }
 0x207   :  { %761 = vsyncpa [#allocation5], 1 }
 0x208   :  { %763 = vsyncpa [#allocation5 + $0x1], 1 }

// kernel: encoder_layer.5
= control target key start
LH: loop header
LB: loop body
LE: loop exit
PB: predicated region body
PF: predicated region fallthrough
CT: control target
= control target key end

     0   :  { %s1622_s27 = smov 0   ;;  %s1884_s0 = inlined_call_operand.vmem [shape: f32[2,16,128], index: 0, kind: input, shape index: {}]   ;;  %s1885_s1 = inlined_call_operand.vmem [shape: f32[16,128], index: 1, kind: input, shape index: {}]   ;;  %s1886_s2 = inlined_call_operand.vmem [shape: f32[16,128], index: 2, kind: input, shape index: {}]   ;;  %s1887_s3 = inlined_call_operand.vmem [shape: f32[16,16], index: 3, kind: input, shape index: {}]   ;;  %s1888_s4 = inlined_call_operand.vmem [shape: bf16[128,384], index: 4, kind: input, shape index: {}]   ;;  %s1889_s5 = inlined_call_operand.vmem [shape: f32[1,384], index: 5, kind: input, shape index: {}]   ;;  %s1890_s6 = inlined_call_operand.vmem [shape: bf16[128,128], index: 6, kind: input, shape index: {}]   ;;  %s1891_s7 = inlined_call_operand.vmem [shape: f32[1,128], index: 7, kind: input, shape index: {}]   ;;  %s1892_s8 = inlined_call_operand.vmem [shape: f32[2,16,128], index: 8, kind: output, shape index: {}]  }
   0x1 LB: > { %s1286_s28 = sadd.s32 4294967295, %s1569_s27   ;;  %p1290_p0 = scmp.ge.s32.totalorder %s1569_s27, 1  ;;  %s1569_s27 = sphi %s1622_s27, %s18_s27  }
   0x2   : > { %p262_p1 = scmp.lt.s32.totalorder %s1569_s27, 3 }
   0x4   : > { %p263_p2 = pnand %p1290_p0, %p262_p1 }
   0x5   : > { %v1491_v0 = vld [vmem:[%s1888_s4 + $0x4] ss:$12 sps:$4 sm:$0xff] (!%p263_p2)   ;;  %v1493_v1 = vld [vmem:[%s1888_s4] ss:$12 sps:$4 sm:$0xff] (!%p263_p2)   ;;  %v1571_v2 = vmov (!%p263_p2), 0   ;;  %v1572_v4 = vmov (!%p263_p2), 0.0   ;;  %v352_v37 = vlaneseq (!%p263_p2) }
   0x6   : > { %266 = sbr.rel (%p263_p2) target bundleno = 1929 (0x789), region = 52  ;;  %527 = vmatprep.mubr.bf16.mxu0 (!%p263_p2), %v1571_v2  ;;  %495 = vmatprep.subr.bf16.mxu0 (!%p263_p2), %v1491_v0  ;;  %v1494_v3 = vld [vmem:[%s1888_s4 + $0x1c] ss:$12 sps:$4 sm:$0xff] (!%p263_p2)   ;;  %v1496_v5 = vld [vmem:[%s1888_s4 + $0x18] ss:$12 sps:$4 sm:$0xff] (!%p263_p2)   ;;  %p296_p3 = scmp.lt.s32.totalorder (!%p263_p2), %s1286_s28, 1 }
   0x7   : > { %1374 = vmatprep.subr.bf16.mxu1 (!%p263_p2), %v1572_v4  ;;  %496 = vmatpush1.bf16.msra.mxu0 (!%p263_p2), %v1493_v1  ;;  %v1497_v6 = vld [vmem:[%s1888_s4 + $0x34] ss:$12 sps:$4 sm:$0xff] (!%p263_p2)   ;;  %v1499_v7 = vld [vmem:[%s1888_s4 + $0x30] ss:$12 sps:$4 sm:$0xff] (!%p263_p2)   ;;  %v1500_v8 = vld [vmem:[%s1888_s4 + $0x4c] ss:$12 sps:$4 sm:$0xff] (!%p263_p2)  }
   0x8   : > { %497 = vmatprep.subr.bf16.mxu0 (!%p263_p2), %v1494_v3  ;;  %v1502_v9 = vld [vmem:[%s1888_s4 + $0x48] ss:$12 sps:$4 sm:$0xff] (!%p263_p2)   ;;  %v1503_v10 = vld [vmem:[%s1888_s4 + $0x64] ss:$12 sps:$4 sm:$0xff] (!%p263_p2)   ;;  %v1505_v12 = vld [vmem:[%s1888_s4 + $0x60] ss:$12 sps:$4 sm:$0xff] (!%p263_p2)  }
   0x9   : > { %v1515_v11 = vld [vmem:[%s1888_s4 + $0x8] ss:$12 sps:$4 sm:$0xff] (!%p263_p2)   ;;  %v1516_v13 = vld [vmem:[%s1888_s4 + $0x20] ss:$12 sps:$4 sm:$0xff] (!%p263_p2)   ;;  %v1508_v15 = vld [vmem:[%s1888_s4 + $0x78] ss:$12 sps:$4 sm:$0xff] (!%p263_p2)  }
   0xa   : > { %1375 = vmatpush3.bf16.msra.mxu1 (!%p263_p2), %v1515_v11  ;;  %v1506_v14 = vld [vmem:[%s1888_s4 + $0x7c] ss:$12 sps:$4 sm:$0xff] (!%p263_p2)   ;;  %v1509_v18 = vld [vmem:[%s1888_s4 + $0x94] ss:$12 sps:$4 sm:$0xff] (!%p263_p2)   ;;  %v1517_v21 = vld [vmem:[%s1888_s4 + $0x38] ss:$12 sps:$4 sm:$0xff] (!%p263_p2)  }
   0xb   : > { %498 = vmatpush1.bf16.msra.mxu0 (!%p263_p2), %v1496_v5  ;;  %1376 = vmatprep.subr.bf16.mxu1 (!%p263_p2), %v1572_v4  ;;  %v309_v19 = vld [vmem:[%s1885_s1] sm:$0xff] (!%p263_p2)  ;;  %v310_v20 = vld [vmem:[%s1885_s1 + $0x8] sm:$0xff] (!%p263_p2)  ;;  %v1511_v22 = vld [vmem:[%s1888_s4 + $0x90] ss:$12 sps:$4 sm:$0xff] (!%p263_p2)   ;;  %vm1573_vm0 = vmmov (!%p263_p2), 0   ;;  %v353_v38 = vshrl.u32 (!%p263_p2), %v352_v37, 7 }
   0xc   : > { %499 = vmatprep.subr.bf16.mxu0 (!%p263_p2), %v1497_v6  ;;  %v313_v23 = vld [vmem:[%s1886_s2] sm:$0xff] (!%p263_p2)  ;;  %v314_v24 = vld [vmem:[%s1886_s2 + $0x8] sm:$0xff] (!%p263_p2)  ;;  %v1518_v25 = vld [vmem:[%s1888_s4 + $0x50] ss:$12 sps:$4 sm:$0xff] (!%p263_p2)   ;;  %1390 = vmatprep.mubr.msk.bf16.mxu1 (!%p263_p2), %vm1573_vm0, %v1572_v4  ;;  %vm584_vm1 = vcmask (!%p263_p2), 261120   ;;  %vm636_vm2 = vcmask (!%p263_p2), 130048  }
   0xd   : > { %s1894_s28 = smov (!%p296_p3, %s1286_s28), 1  ;;  %v1512_v26 = vld [vmem:[%s1888_s4 + $0xac] ss:$12 sps:$4 sm:$0xff]   ;;  %v1514_v31 = vld [vmem:[%s1888_s4 + $0xa8] ss:$12 sps:$4 sm:$0xff]   ;;  %v354_v39 = vsub.s32 0, %v353_v38 }
   0xe   : > { %s1338_s23 = sshll.u32 %s1894_s28, 4  ;;  %1377 = vmatpush3.bf16.msra.mxu1 %v1516_v13  ;;  %v1519_v32 = vld [vmem:[%s1888_s4 + $0x68] ss:$12 sps:$4 sm:$0xff]   ;;  %v1520_v34 = vld [vmem:[%s1888_s4 + $0x80] ss:$12 sps:$4 sm:$0xff]   ;;  %v358_v41 = vsub.s32 1, %v353_v38 }
   0xf   : > { %500 = vmatpush1.bf16.msra.mxu0 %v1499_v7  ;;  %s300_s12 = scalar_lea.vmem %s1884_s0, %s1338_s23  ;;  %1378 = vmatprep.subr.bf16.mxu1 %v1572_v4  ;;  %v1521_v35 = vld [vmem:[%s1888_s4 + $0x98] ss:$12 sps:$4 sm:$0xff]   ;;  %v1522_v36 = vld [vmem:[%s1888_s4 + $0xb0] ss:$12 sps:$4 sm:$0xff]   ;;  %v350_v40 = vld [vmem:[%s1889_s5] sm:$0x7]  ;;  %s305_s19 = scalar_lea.vmem %s1892_s8, %s1338_s23 }
  0x10   : > { %501 = vmatprep.subr.bf16.mxu0 %v1500_v8  ;;  %v307_v16 = vld [vmem:[%s300_s12] sm:$0xff]  ;;  %v308_v17 = vld [vmem:[%s300_s12 + $0x8] sm:$0xff]  ;;  %v355_v42 = vrot.slane %v350_v40, %v354_v39  ;;  %v359_v44 = vrot.slane %v350_v40, %v358_v41  ;;  %v362_v55 = vsub.s32 2, %v353_v38  ;;  %s1574_s15 = smov 96   ;;  %s1575_s16 = smov 32   ;;  %vm1108_vm3 = vcmask 523264  }
  0x11   : > { %v311_v27 = vmul.f32 %v309_v19, %v307_v16  ;;  %v312_v28 = vmul.f32 %v310_v20, %v308_v17  ;;  %v1759_v1 = vld [vmem:[%s1887_s3] sm:$0xff]  ;;  %v1764_v6 = vld [vmem:[%s1887_s3 + $0x8] sm:$0xff]  ;;  %s1576_s17 = smov 64   ;;  %vm1111_vm4 = vcmask 785408  }
  0x12   : > { %1379 = vmatpush3.bf16.msra.mxu1 %v1517_v21  ;;  %v363_v56 = vrot.slane %v350_v40, %v362_v55 }
  0x13   : > { %502 = vmatpush1.bf16.msra.mxu0 %v1502_v9  ;;  %1380 = vmatprep.subr.bf16.mxu1 %v1572_v4  ;;  %v1711_v29 = vadd.f32 %v313_v23, %v311_v27  ;;  %v1713_v30 = vadd.f32 %v314_v24, %v312_v28 }
  0x14   : > { %503 = vmatprep.subr.bf16.mxu0 %v1503_v10 }
  0x15   : > { %v317_v33 = vpack.c.bf16 %v1713_v30, %v1711_v29 }
  0x16   : > { %1381 = vmatpush3.bf16.msra.mxu1 %v1518_v25 }
  0x17   : > { %504 = vmatpush1.bf16.msra.mxu0 %v1505_v12  ;;  %1382 = vmatprep.subr.bf16.mxu1 %v1572_v4 }
  0x18   : > { %505 = vmatprep.subr.bf16.mxu0 %v1506_v14 }
  0x1a   : > { %1383 = vmatpush3.bf16.msra.mxu1 %v1519_v32 }
  0x1b   : > { %506 = vmatpush1.bf16.msra.mxu0 %v1508_v15  ;;  %1384 = vmatprep.subr.bf16.mxu1 %v1572_v4 }
  0x1c   : > { %507 = vmatprep.subr.bf16.mxu0 %v1509_v18 }
  0x1e   : > { %1385 = vmatpush3.bf16.msra.mxu1 %v1520_v34 }
  0x1f   : > { %508 = vmatpush1.bf16.msra.mxu0 %v1511_v22  ;;  %1386 = vmatprep.subr.bf16.mxu1 %v1572_v4 }
  0x20   : > { %509 = vmatprep.subr.bf16.mxu0 %v1512_v26 }
  0x22   : > { %1387 = vmatpush3.bf16.msra.mxu1 %v1521_v35 }
  0x23   : > { %510 = vmatpush1.bf16.msra.mxu0 %v1514_v31  ;;  %1388 = vmatprep.subr.bf16.mxu1 %v1572_v4 }
  0x24   : > { %1418 = vmatprep.subr.bf16.mxu0 %v1572_v4 }
  0x26   : > { %528 = vmatmul.mubr.bf16.vlgmr.msra.gmra.mrb[0].mxu0 %v317_v33  ;;  %1389 = vmatpush3.bf16.msra.mxu1 %v1522_v36 }
  0x27   : > { %1394 = vmatprep.subr.bf16.mxu1 %v1572_v4  ;;  %1420 = vmatprep.mubr.msk.bf16.mxu0 %vm1573_vm0, %v1572_v4 }
  0x29   : > { %1391 = vmatmul.mubr.bf16.vlgmr.msra.gmra.mrb[0].mxu1 %v317_v33 }
  0x2a   : > { %1396 = vmatprep.mubr.msk.bf16.mxu1 %vm1573_vm0, %v1572_v4 }
  0xf9   : > { %v529_v43 = vpop.f32.mrb[0].mxu0 }
  0xfa   : > { %v531_v45 = vpop.f32.mrb[1].mxu0  ;;  %v530_v47 = vadd.f32 %v529_v43, %v355_v42 }
  0xfb   : > { %v533_v46 = vpop.f32.mrb[2].mxu0  ;;  %v532_v50 = vadd.f32 %v531_v45, %v359_v44 }
  0xfc   : > { %v534_v48 = vadd.f32 %v533_v46, %v355_v42  ;;  %v535_v49 = vpop.f32.mrb[3].mxu0  ;;  %v572_v57 = vpop.f32.mrb[0].mxu1 }
  0xfd   : > { %v536_v51 = vadd.f32 %v535_v49, %v359_v44  ;;  %v573_v58 = vadd.f32 %v572_v57, %v363_v56  ;;  %v1392_v59 = vpop.f32.mrb[1].mxu1 }
  0xfe   : > { %v579_v52 = vpack.c.bf16 %v534_v48, %v530_v47  ;;  %v575_v60 = vpop.f32.mrb[2].mxu1 }
  0xff   : > { %v580_v53 = vpack.c.bf16 %v536_v51, %v532_v50  ;;  %v576_v61 = vadd.f32 %v575_v60, %v363_v56  ;;  %v1393_v62 = vpop.f32.mrb[3].mxu1 }
 0x101   : > { %v589_v54 = vsel %vm584_vm1, %v580_v53, 0  ;;  %v1752_v63 = vpack.c.bf16 %v576_v61, %v573_v58 }
 0x102   : > { %1395 = vmatpush3.bf16.xpose.msra.mxu1 %v589_v54 }
 0x103   : > { %1400 = vmatprep.subr.bf16.mxu1 %v1572_v4 }
 0x109   : > { %1397 = vmatmul.mubr.msk.bf16.vlgmr.msra.gmra.mrb[4].mxu1 %vm584_vm1, %v579_v52 }
 0x10a   : > { %1402 = vmatprep.mubr.msk.bf16.mxu1 %vm1573_vm0, %v1572_v4  ;;  %1401 = vmatpush3.bf16.msra.mxu1 %v1752_v63 }
 0x10b   : > { %1406 = vmatprep.subr.bf16.mxu1 %v1572_v4 }
 0x1dc   : > { %v625_v0 = vpop.f32.mrb[4].mxu1 }
 0x1dd   : > { %v632_v2 = vmul.f32 0.17677669, %v625_v0  ;;  %v1398_v3 = vpop.f32.mrb[5].mxu1 }
 0x1de   : > { %v628_v5 = vpop.f32.mrb[6].mxu1 }
 0x1df   : > { %v633_v7 = vmul.f32 0.17677669, %v628_v5  ;;  %v1399_v8 = vpop.f32.mrb[7].mxu1  ;;  %v634_v9 = vadd.f32 %v632_v2, %v1759_v1 }
 0x1e1   : > { %v637_v10 = vsel %vm636_vm2, %v634_v9, -inf  ;;  %v635_v11 = vadd.f32 %v633_v7, %v1764_v6 }
 0x1e2   : > { %638 = vmax.xlane.f32.xlu0 %v637_v10 }
 0x1e3   : > { %v640_v12 = vsel %vm636_vm2, %v635_v11, -inf }
 0x1e6   : > { %641 = vmax.xlane.f32.xlu0 %v640_v12 }
 0x1fc   : > { %708 = vrot.lane.b32.xlu0 %v580_v53, %s1574_s15 }
 0x200   : > { %959 = vrot.lane.b32.xlu0 %v580_v53, %s1575_s16 }
 0x26f   : > { %v639_v13 = vpop.xlane.xlu0 %638 }
 0x270   : > { %v643_v14 = vsub.f32 %v634_v9, %v639_v13 }
 0x272   : > { %v645_v15 = vmul.f32 1.442695, %v643_v14 }
 0x273   : > { %v642_v16 = vpop.xlane.xlu0 %641 }
 0x274   : > { %1531 = vpow2.f32 %v645_v15  ;;  %v644_v17 = vsub.f32 %v635_v11, %v642_v16 }
 0x276   : > { %v647_v18 = vmul.f32 1.442695, %v644_v17 }
 0x277   : > { %v709_v26 = vpop.permute.xlu0 %708 }
 0x278   : > { %1533 = vpow2.f32 %v647_v18  ;;  %v714_v37 = vsel %vm584_vm1, %v709_v26, 0 }
 0x27b   : > { %v960_v35 = vpop.permute.xlu0 %959 }
 0x27c   : > { %v965_v39 = vsel %vm584_vm1, %v960_v35, 0 }
 0x27e   : > { %v1532_v19 = vpop.eup %1531 }
 0x27f   : > { %v649_v20 = vsel %vm636_vm2, %v1532_v19, 0.0 }
 0x280   : > { %650 = vadd.xlane.f32.xlu1 %v649_v20 }
 0x282   : > { %v1534_v21 = vpop.eup %1533 }
 0x283   : > { %v652_v22 = vsel %vm636_vm2, %v1534_v21, 0.0 }
 0x284   : > { %653 = vadd.xlane.f32.xlu1 %v652_v22 }
 0x295   : > { %705 = vrot.lane.b32.xlu1 %v579_v52, %s1574_s15 }
 0x299   : > { %834 = vrot.lane.b32.xlu1 %v580_v53, %s1576_s17 }
 0x29d   : > { %832 = vrot.lane.b32.xlu1 %v579_v52, %s1576_s17 }
 0x2a1   : > { %957 = vrot.lane.b32.xlu1 %v579_v52, %s1575_s16 }
 0x30d   : > { %v651_v23 = vpop.xlane.xlu1 %650 }
 0x30e   : > { %1535 = vrcp.f32 %v651_v23 }
 0x311   : > { %v654_v24 = vpop.xlane.xlu1 %653 }
 0x312   : > { %1537 = vrcp.f32 %v654_v24 }
 0x315   : > { %v706_v25 = vpop.permute.xlu1 %705 }
 0x318   : > { %v1536_v28 = vpop.eup %1535 }
 0x319   : > { %v835_v27 = vpop.permute.xlu1 %834  ;;  %v657_v33 = vmul.f32 %v1536_v28, %v1532_v19 }
 0x31a   : > { %v840_v31 = vsel %vm584_vm1, %v835_v27, 0 }
 0x31b   : > { %1419 = vmatpush3.bf16.xpose.msra.mxu0 %v840_v31 }
 0x31c   : > { %v1538_v32 = vpop.eup %1537  ;;  %1430 = vmatprep.subr.bf16.mxu0 %v1572_v4 }
 0x31d   : > { %v658_v34 = vmul.f32 %v1538_v32, %v1534_v21  ;;  %v833_v38 = vpop.permute.xlu1 %832 }
 0x31f   : > { %v659_v36 = vpack.c.bf16 %v658_v34, %v657_v33 }
 0x321   : > { %1403 = vmatmul.mubr.msk.bf16.vlgmr.msra.gmra.mrb[8].mxu1 %vm636_vm2, %v659_v36  ;;  %v958_v40 = vpop.permute.xlu1 %957 }
 0x322   : > { %1407 = vmatpush3.bf16.xpose.msra.mxu1 %v714_v37  ;;  %1421 = vmatmul.mubr.msk.bf16.vlgmr.msra.gmra.mrb[4].mxu0 %vm584_vm1, %v833_v38 }
 0x323   : > { %1431 = vmatpush3.bf16.xpose.msra.mxu0 %v965_v39  ;;  %1408 = vmatprep.mubr.msk.bf16.mxu1 %vm1573_vm0, %v1572_v4 }
 0x324   : > { %1432 = vmatprep.mubr.msk.bf16.mxu0 %vm1573_vm0, %v1572_v4  ;;  %1412 = vmatprep.subr.bf16.mxu1 %v1572_v4 }
 0x325   : > { %1442 = vmatprep.subr.bf16.mxu0 %v1572_v4 }
 0x329   : > { %1409 = vmatmul.mubr.msk.bf16.vlgmr.msra.gmra.mrb[12].mxu1 %vm584_vm1, %v706_v25 }
 0x32a   : > { %1433 = vmatmul.mubr.msk.bf16.vlgmr.msra.gmra.mrb[8].mxu0 %vm584_vm1, %v958_v40  ;;  %1414 = vmatprep.mubr.msk.bf16.mxu1 %vm1573_vm0, %v1572_v4 }
 0x32b   : > { %1458 = vmatprep.mubr.msk.bf16.mxu0 %vm1573_vm0, %v1572_v4 }
 0x3f4   : > { %v1796_v41 = vpop.f32.mrb[8].mxu1 }
 0x3f5   : > { %v1404_v42 = vpop.f32.mrb[9].mxu1  ;;  %v876_v43 = vpop.f32.mrb[4].mxu0 }
 0x3f6   : > { %v1798_v44 = vpop.f32.mrb[10].mxu1  ;;  %v1422_v45 = vpop.f32.mrb[5].mxu0  ;;  %v883_v50 = vmul.f32 0.17677669, %v876_v43 }
 0x3f7   : > { %v1405_v46 = vpop.f32.mrb[11].mxu1  ;;  %v879_v47 = vpop.f32.mrb[6].mxu0 }
 0x3f8   : > { %v1423_v48 = vpop.f32.mrb[7].mxu0  ;;  %v884_v62 = vmul.f32 0.17677669, %v879_v47  ;;  %v885_v3 = vadd.f32 %v883_v50, %v1759_v1 }
 0x3fa   : > { %v887_v9 = vsel %vm636_vm2, %v885_v3, -inf  ;;  %v886_v10 = vadd.f32 %v884_v62, %v1764_v6 }
 0x3fc   : > { %v750_v49 = vpop.f32.mrb[12].mxu1  ;;  %v890_v12 = vsel %vm636_vm2, %v886_v10, -inf }
 0x3fd   : > { %v757_v51 = vmul.f32 0.17677669, %v750_v49  ;;  %v1410_v52 = vpop.f32.mrb[13].mxu1  ;;  %v1001_v53 = vpop.f32.mrb[8].mxu0 }
 0x3fe   : > { %v753_v54 = vpop.f32.mrb[14].mxu1  ;;  %v1434_v55 = vpop.f32.mrb[9].mxu0  ;;  %v1008_v8 = vmul.f32 0.17677669, %v1001_v53 }
 0x3ff   : > { %v758_v56 = vmul.f32 0.17677669, %v753_v54  ;;  %v1411_v57 = vpop.f32.mrb[15].mxu1  ;;  %v1004_v58 = vpop.f32.mrb[10].mxu0  ;;  %v759_v59 = vadd.f32 %v757_v51, %v1759_v1 }
 0x400   : > { %v1009_v60 = vmul.f32 0.17677669, %v1004_v58  ;;  %v1435_v61 = vpop.f32.mrb[11].mxu0  ;;  %v1010_v13 = vadd.f32 %v1008_v8, %v1759_v1 }
 0x401   : > { %v761_v0 = vsel %vm636_vm2, %v759_v59, -inf  ;;  %v760_v2 = vadd.f32 %v758_v56, %v1764_v6 }
 0x402   : > { %762 = vmax.xlane.f32.xlu0 %v761_v0  ;;  %v1011_v7 = vadd.f32 %v1009_v60, %v1764_v6  ;;  %v1012_v14 = vsel %vm636_vm2, %v1010_v13, -inf }
 0x403   : > { %v764_v5 = vsel %vm636_vm2, %v760_v2, -inf }
 0x404   : > { %765 = vmax.xlane.f32.xlu1 %v764_v5  ;;  %v1015_v11 = vsel %vm636_vm2, %v1011_v7, -inf }
 0x406   : > { %888 = vmax.xlane.f32.xlu0 %v887_v9 }
 0x408   : > { %1016 = vmax.xlane.f32.xlu1 %v1015_v11  ;;  %v1524_v11 = vld [vmem:[%s1890_s6 + $0x8] sm:$0xff]  }
 0x40a   : > { %891 = vmax.xlane.f32.xlu0 %v890_v12  ;;  %v1525_v12 = vld [vmem:[%s1890_s6 + $0x10] sm:$0xff]  }
 0x40e   : > { %1013 = vmax.xlane.f32.xlu0 %v1012_v14  ;;  %v1527_v14 = vld [vmem:[%s1890_s6 + $0x20] sm:$0xff]  }
 0x48f   : > { %v763_v15 = vpop.xlane.xlu0 %762 }
 0x490   : > { %v767_v23 = vsub.f32 %v759_v59, %v763_v15 }
 0x491   : > { %v766_v16 = vpop.xlane.xlu1 %765 }
 0x492   : > { %v768_v24 = vsub.f32 %v760_v2, %v766_v16  ;;  %v769_v28 = vmul.f32 1.442695, %v767_v23  ;;  %v1530_v23 = vld [vmem:[%s1890_s6 + $0x38] sm:$0xff]  }
 0x493   : > { %v889_v17 = vpop.xlane.xlu0 %888 }
 0x494   : > { %v893_v18 = vsub.f32 %v885_v3, %v889_v17  ;;  %v771_v31 = vmul.f32 1.442695, %v768_v24  ;;  %v1528_v17 = vld [vmem:[%s1890_s6 + $0x28] sm:$0xff]  }
 0x495   : > { %v1017_v19 = vpop.xlane.xlu1 %1016 }
 0x496   : > { %v895_v20 = vmul.f32 1.442695, %v893_v18  ;;  %v1019_v21 = vsub.f32 %v1011_v7, %v1017_v19 }
 0x497   : > { %v892_v6 = vpop.xlane.xlu0 %891 }
 0x498   : > { %1539 = vpow2.f32 %v895_v20  ;;  %v894_v22 = vsub.f32 %v886_v10, %v892_v6  ;;  %v1022_v25 = vmul.f32 1.442695, %v1019_v21  ;;  %v1523_v10 = vld [vmem:[%s1890_s6] sm:$0xff]   ;;  %v1529_v21 = vld [vmem:[%s1890_s6 + $0x30] sm:$0xff]  }
 0x499   : > { %1443 = vmatpush3.bf16.msra.mxu0 %v1523_v10 }
 0x49a   : > { %v897_v26 = vmul.f32 1.442695, %v894_v22  ;;  %1444 = vmatprep.subr.bf16.mxu0 %v1572_v4 }
 0x49b   : > { %v1014_v27 = vpop.xlane.xlu0 %1013 }
 0x49c   : > { %1541 = vpow2.f32 %v897_v26  ;;  %v1018_v1 = vsub.f32 %v1010_v13, %v1014_v27  ;;  %v1526_v13 = vld [vmem:[%s1890_s6 + $0x18] sm:$0xff]  }
 0x49d   : > { %1543 = vpow2.f32 %v1022_v25  ;;  %1445 = vmatpush3.bf16.msra.mxu0 %v1524_v11 }
 0x49e   : > { %v1020_v32 = vmul.f32 1.442695, %v1018_v1  ;;  %1446 = vmatprep.subr.bf16.mxu0 %v1572_v4 }
 0x4a0   : > { %1545 = vpow2.f32 %v1020_v32 }
 0x4a1   : > { %1547 = vpow2.f32 %v769_v28  ;;  %1447 = vmatpush3.bf16.msra.mxu0 %v1525_v12 }
 0x4a2   : > { %v1540_v33 = vpop.eup %1539  ;;  %1549 = vpow2.f32 %v771_v31  ;;  %1448 = vmatprep.subr.bf16.mxu0 %v1572_v4 }
 0x4a3   : > { %v899_v34 = vsel %vm636_vm2, %v1540_v33, 0.0 }
 0x4a4   : > { %900 = vadd.xlane.f32.xlu0 %v899_v34 }
 0x4a5   : > { %1449 = vmatpush3.bf16.msra.mxu0 %v1526_v13 }
 0x4a6   : > { %v1542_v35 = vpop.eup %1541  ;;  %1450 = vmatprep.subr.bf16.mxu0 %v1572_v4 }
 0x4a7   : > { %v902_v36 = vsel %vm636_vm2, %v1542_v35, 0.0  ;;  %v1544_v37 = vpop.eup %1543 }
 0x4a8   : > { %903 = vadd.xlane.f32.xlu1 %v902_v36  ;;  %v1027_v42 = vsel %vm636_vm2, %v1544_v37, 0.0 }
 0x4a9   : > { %1451 = vmatpush3.bf16.msra.mxu0 %v1527_v14 }
 0x4aa   : > { %v1546_v38 = vpop.eup %1545  ;;  %1452 = vmatprep.subr.bf16.mxu0 %v1572_v4 }
 0x4ab   : > { %v1548_v39 = vpop.eup %1547  ;;  %v1024_v40 = vsel %vm636_vm2, %v1546_v38, 0.0 }
 0x4ac   : > { %v1550_v43 = vpop.eup %1549  ;;  %1025 = vadd.xlane.f32.xlu0 %v1024_v40  ;;  %1028 = vadd.xlane.f32.xlu1 %v1027_v42  ;;  %v773_v45 = vsel %vm636_vm2, %v1548_v39, 0.0 }
 0x4ad   : > { %v776_v46 = vsel %vm636_vm2, %v1550_v43, 0.0  ;;  %1453 = vmatpush3.bf16.msra.mxu0 %v1528_v17 }
 0x4ae   : > { %1454 = vmatprep.subr.bf16.mxu0 %v1572_v4 }
 0x4b0   : > { %774 = vadd.xlane.f32.xlu0 %v773_v45  ;;  %777 = vadd.xlane.f32.xlu1 %v776_v46 }
 0x4b1   : > { %1455 = vmatpush3.bf16.msra.mxu0 %v1529_v21 }
 0x4b2   : > { %1456 = vmatprep.subr.bf16.mxu0 %v1572_v4 }
 0x4b5   : > { %1457 = vmatpush3.bf16.msra.mxu0 %v1530_v23 }
 0x4c1   : > { %910 = vrot.lane.b32.xlu1 %v1752_v63, %s1576_s17 }
 0x4c5   : > { %1035 = vrot.lane.b32.xlu1 %v1752_v63, %s1575_s16 }
 0x4c6   : > { %785 = vrot.lane.b32.xlu0 %v1752_v63, %s1574_s15 }
 0x531   : > { %v901_v47 = vpop.xlane.xlu0 %900 }
 0x535   : > { %v904_v48 = vpop.xlane.xlu1 %903 }
 0x539   : > { %v1026_v49 = vpop.xlane.xlu0 %1025  ;;  %v1029_v50 = vpop.xlane.xlu1 %1028 }
 0x53d   : > { %v775_v51 = vpop.xlane.xlu0 %774  ;;  %v778_v52 = vpop.xlane.xlu1 %777 }
 0x53e   : > { %1551 = vrcp.f32 %v775_v51 }
 0x53f   : > { %1553 = vrcp.f32 %v778_v52 }
 0x540   : > { %1555 = vrcp.f32 %v904_v48 }
 0x541   : > { %v786_v53 = vpop.permute.xlu0 %785  ;;  %1557 = vrcp.f32 %v901_v47  ;;  %v911_v59 = vpop.permute.xlu1 %910 }
 0x542   : > { %1413 = vmatpush3.bf16.msra.mxu1 %v786_v53  ;;  %1559 = vrcp.f32 %v1026_v49 }
 0x543   : > { %1424 = vmatprep.subr.bf16.mxu1 %v1572_v4  ;;  %1561 = vrcp.f32 %v1029_v50  ;;  %v1327_v50 = vld [vmem:[%s1891_s7] ss:$0 sm:$0xff] }
 0x545   : > { %v1036_v5 = vpop.permute.xlu1 %1035 }
 0x548   : > { %v1552_v54 = vpop.eup %1551 }
 0x549   : > { %v1554_v55 = vpop.eup %1553  ;;  %v781_v56 = vmul.f32 %v1552_v54, %v1548_v39 }
 0x54a   : > { %v782_v57 = vmul.f32 %v1554_v55, %v1550_v43  ;;  %v1556_v58 = vpop.eup %1555 }
 0x54b   : > { %v1558_v60 = vpop.eup %1557  ;;  %v908_v61 = vmul.f32 %v1556_v58, %v1542_v35 }
 0x54c   : > { %v783_v63 = vpack.c.bf16 %v782_v57, %v781_v56  ;;  %v907_v62 = vmul.f32 %v1558_v60, %v1540_v33  ;;  %v1560_v0 = vpop.eup %1559 }
 0x54d   : > { %v1562_v3 = vpop.eup %1561  ;;  %v1032_v7 = vmul.f32 %v1560_v0, %v1546_v38 }
 0x54e   : > { %1415 = vmatmul.mubr.msk.bf16.vlgmr.msra.gmra.mrb[16].mxu1 %vm636_vm2, %v783_v63  ;;  %v909_v2 = vpack.c.bf16 %v908_v61, %v907_v62  ;;  %v1033_v8 = vmul.f32 %v1562_v3, %v1544_v37 }
 0x54f   : > { %1425 = vmatpush3.bf16.msra.mxu1 %v911_v59  ;;  %1426 = vmatprep.mubr.msk.bf16.mxu1 %vm1573_vm0, %v1572_v4 }
 0x550   : > { %1436 = vmatprep.subr.bf16.mxu1 %v1572_v4  ;;  %v1034_v9 = vpack.c.bf16 %v1033_v8, %v1032_v7 }
 0x556   : > { %1427 = vmatmul.mubr.msk.bf16.vlgmr.msra.gmra.mrb[20].mxu1 %vm636_vm2, %v909_v2 }
 0x557   : > { %1437 = vmatpush3.bf16.msra.mxu1 %v1036_v5  ;;  %1438 = vmatprep.mubr.msk.bf16.mxu1 %vm1573_vm0, %v1572_v4 }
 0x55e   : > { %1439 = vmatmul.mubr.msk.bf16.vlgmr.msra.gmra.mrb[24].mxu1 %vm636_vm2, %v1034_v9 }
 0x621   : > { %v825_v15 = vpop.f32.mrb[16].mxu1 }
 0x622   : > { %v1416_v16 = vpop.f32.mrb[17].mxu1 }
 0x623   : > { %v828_v18 = vpop.f32.mrb[18].mxu1 }
 0x624   : > { %v1476_v19 = vpack.i.bf16 %v828_v18, %v825_v15  ;;  %v1417_v20 = vpop.f32.mrb[19].mxu1 }
 0x626   : > { %1477 = vrot.lane.b32.xlu1 %v1476_v19, %s1575_s16 }
 0x629   : > { %v950_v6 = vpop.f32.mrb[20].mxu1 }
 0x62a   : > { %v1428_v22 = vpop.f32.mrb[21].mxu1 }
 0x62b   : > { %v953_v24 = vpop.f32.mrb[22].mxu1 }
 0x62c   : > { %v1481_v25 = vpack.i.bf16 %v953_v24, %v950_v6  ;;  %v1429_v26 = vpop.f32.mrb[23].mxu1 }
 0x62e   : > { %1482 = vrot.lane.b32.xlu0 %v1481_v25, %s1576_s17 }
 0x631   : > { %v1075_v27 = vpop.f32.mrb[24].mxu1 }
 0x632   : > { %v1440_v1 = vpop.f32.mrb[25].mxu1 }
 0x633   : > { %v1078_v28 = vpop.f32.mrb[26].mxu1 }
 0x634   : > { %v1486_v31 = vpack.i.bf16 %v1078_v28, %v1075_v27  ;;  %v1441_v32 = vpop.f32.mrb[27].mxu1 }
 0x636   : > { %1487 = vrot.lane.b32.xlu1 %v1486_v31, %s1574_s15 }
 0x698   : > { %v1478_v33 = vpop.permute.xlu1 %1477 }
 0x699   : > { %v1480_v34 = vunpack.i.h.bf16 %v1478_v33  ;;  %v1479_v35 = vunpack.i.l.bf16 %v1478_v33 }
 0x69b   : > { %v1107_v39 = vsel %vm584_vm1, %v1798_v44, %v1480_v34  ;;  %v1106_v40 = vsel %vm584_vm1, %v1796_v41, %v1479_v35 }
 0x6a0   : > { %v1483_v4 = vpop.permute.xlu0 %1482 }
 0x6a1   : > { %v1485_v36 = vunpack.i.h.bf16 %v1483_v4  ;;  %v1484_v37 = vunpack.i.l.bf16 %v1483_v4 }
 0x6a3   : > { %v1110_v45 = vsel %vm1108_vm3, %v1107_v39, %v1485_v36  ;;  %v1109_v46 = vsel %vm1108_vm3, %v1106_v40, %v1484_v37 }
 0x6a8   : > { %v1488_v38 = vpop.permute.xlu1 %1487 }
 0x6a9   : > { %v1490_v42 = vunpack.i.h.bf16 %v1488_v38  ;;  %v1489_v43 = vunpack.i.l.bf16 %v1488_v38 }
 0x6ab   : > { %v1113_v47 = vsel %vm1111_vm4, %v1110_v45, %v1490_v42  ;;  %v1112_v48 = vsel %vm1111_vm4, %v1109_v46, %v1489_v43 }
 0x6ac   : > { %v1114_v49 = vpack.c.bf16 %v1113_v47, %v1112_v48 }
 0x6ae   : > { %1459 = vmatmul.mubr.bf16.vlgmr.msra.gmra.mrb[12].mxu0 %v1114_v49 }
 0x781   : > { %v1220_v51 = vpop.f32.mrb[12].mxu0 }
 0x782   : > { %v1221_v52 = vadd.f32 %v1327_v50, %v1220_v51  ;;  %v1460_v53 = vpop.f32.mrb[13].mxu0 }
 0x783   : > { %v1223_v41 = vpop.f32.mrb[14].mxu0 }
 0x784   : > { %v1227_v44 = vadd.f32 %v1221_v52, %v1711_v29  ;;  %v1224_v54 = vadd.f32 %v1327_v50, %v1223_v41  ;;  %v1461_v55 = vpop.f32.mrb[15].mxu0 }
 0x786   : > { %1229 = vst [vmem:[%s305_s19] sm:$0xff] %v1227_v44  ;;  %v1228_v56 = vadd.f32 %v1224_v54, %v1713_v30 }
 0x788   : > { %1230 = vst [vmem:[%s305_s19 + $0x8] sm:$0xff] %v1228_v56 }
 0x789 PF: > { %s18_s27 = sadd.s32 1, %s1569_s27  }
 0x78a   : > { %p15_p4 = scmp.ge.s32.totalorder %s18_s27, 4  }
 0x78c   :  { %17 = sbr.rel (!%p15_p4) target bundleno = 1 (0x1), region = 82 }

</bundles_post_ra>
